<compile_context>
chip_gen: v7x
topology: tpu7x:2x2x1
jax: 0.10.0
libtpu: 0.0.40
codegen_flags: <defaults>
</compile_context>

<pallas_src>
import functools
import math

import jax
import jax.numpy as jnp
from jax import lax
from jax.experimental import pallas as pl
from jax.experimental.pallas import tpu as pltpu

# Matmul-operand dtype (accumulation is always f32, softmax/LN/residual math is f32).
# bf16 is MXU-native on v5e/v6e/v7x; use jnp.float32 for bit-closer PyTorch parity.
MATMUL_DTYPE = jnp.bfloat16


# ----------------------------- in-kernel helpers -----------------------------

def _dot_t(a, b):
    """a: (M, K), b: (N, K) torch nn.Linear layout -> (M, N).
    Contract K on both operands (no transpose); bf16 operands, f32 accumulate."""
    return lax.dot_general(
        a.astype(MATMUL_DTYPE), b.astype(MATMUL_DTYPE),
        dimension_numbers=(((1,), (1,)), ((), ())),
        preferred_element_type=jnp.float32)


def _layernorm(y, g, b, eps):
    """LayerNorm over the last dim, f32 math (matches torch.nn.LayerNorm)."""
    mu = jnp.mean(y, axis=-1, keepdims=True)
    var = jnp.mean(jnp.square(y - mu), axis=-1, keepdims=True)
    return (y - mu) * lax.rsqrt(var + eps) * g + b


def _mha(attn_ref, q, k, v, nhead):
    """Multi-head attention; q: (Lq, E) f32, k/v: (S, E) f32.
    Writes the concatenated head outputs (pre-out_proj) into attn_ref (Lq, E) f32
    via static lane-slice stores (no jnp.concatenate)."""
    E = q.shape[-1]
    dh = E // nhead
    scale = 1.0 / math.sqrt(dh)
    for h in range(nhead):                         # static, small, unrolled
        sl = slice(h * dh, (h + 1) * dh)
        qh = q[:, sl] * scale                      # fold 1/sqrt(dh) into q: (Lq, dh)
        s = lax.dot_general(                       # (Lq, S) scores, f32
            qh.astype(MATMUL_DTYPE), k[:, sl].astype(MATMUL_DTYPE),
            dimension_numbers=(((1,), (1,)), ((), ())),
            preferred_element_type=jnp.float32)
        m = jnp.max(s, axis=-1, keepdims=True)
        p = jnp.exp(s - m)
        denom = jnp.sum(p, axis=-1, keepdims=True)
        oh = jnp.dot(p.astype(MATMUL_DTYPE), v[:, sl].astype(MATMUL_DTYPE),
                     preferred_element_type=jnp.float32)          # (Lq, dh)
        # Normalize AFTER PV (scales (Lq, dh), not (Lq, S)); exact reciprocal.
        attn_ref[:, sl] = oh * pl.reciprocal(denom, approx=False)


# ----------------------------- fused decoder-layer kernel -----------------------------

def _decoder_layer_kernel(
        x_ref, tgt_ref, mem_ref,
        sa_w_ref, sa_b_ref, sa_ow_ref, sa_ob_ref, n1g_ref, n1b_ref,
        ca_w_ref, ca_b_ref, ca_ow_ref, ca_ob_ref, n2g_ref, n2b_ref,
        w1_ref, b1_ref, w2_ref, b2_ref, n3g_ref, n3b_ref,
        o_ref,
        attn_ref,
        *, nhead, eps):
    E = x_ref.shape[-1]
    x = x_ref[0].astype(jnp.float32)               # (tl, E) query / residual rows

    # ---- self-attention block: in_proj -> MHA -> out_proj -> +residual -> LN1 ----
    sa_w = sa_w_ref[...]                           # (3E, E) resident weight
    sa_b = sa_b_ref[...]                           # (1, 3E) f32
    q = _dot_t(x, sa_w[:E]) + sa_b[:, :E]          # (tl, E)
    kv = _dot_t(tgt_ref[0], sa_w[E:]) + sa_b[:, E:]      # (L, 2E)  K/V from full tgt
    _mha(attn_ref, q, kv[:, :E], kv[:, E:], nhead)
    y = _dot_t(attn_ref[...], sa_ow_ref[...]) + sa_ob_ref[...] + x
    x = _layernorm(y, n1g_ref[...], n1b_ref[...], eps)

    # ---- cross-attention block: Q/KV proj -> MHA -> out_proj -> +residual -> LN2 ----
    ca_w = ca_w_ref[...]
    ca_b = ca_b_ref[...]
    q = _dot_t(x, ca_w[:E]) + ca_b[:, :E]          # (tl, E)
    kv = _dot_t(mem_ref[0], ca_w[E:]) + ca_b[:, E:]      # (S, 2E)  K/V from memory
    _mha(attn_ref, q, kv[:, :E], kv[:, E:], nhead)
    y = _dot_t(attn_ref[...], ca_ow_ref[...]) + ca_ob_ref[...] + x
    x = _layernorm(y, n2g_ref[...], n2b_ref[...], eps)

    # ---- FFN block: lin1 -> ReLU -> lin2 -> +residual -> LN3 ((tl, F) never leaves VMEM)
    h = jnp.maximum(_dot_t(x, w1_ref[...]) + b1_ref[...], 0.0)    # (tl, F) f32
    y = _dot_t(h, w2_ref[...]) + b2_ref[...] + x
    x = _layernorm(y, n3g_ref[...], n3b_ref[...], eps)

    o_ref[0] = x.astype(o_ref.dtype)


# ----------------------------- wrapper -----------------------------

def _query_tile(L, max_tile=256):
    """Fixed 8-aligned query-row tile; pl.cdiv grid handles any remainder."""
    return L if L <= max_tile else max_tile


def _resident_spec(arr):
    """Grid-invariant BlockSpec: fetched once, stays resident in VMEM."""
    nd = arr.ndim
    return pl.BlockSpec(arr.shape, lambda *_: (0,) * nd)


def transformer_decoder_layer(tgt, memory, params, nhead, eps=1e-5):
    """forward_post with all masks / key-padding masks / pos / query_pos = None,
    dropout = identity (eval), activation = relu, is_mask = False.
    tgt: (L, B, E), memory: (S, B, E) -> (L, B, E)."""
    L, B, E = tgt.shape
    S = memory.shape[0]

    # Batch-first internally so each grid step sees contiguous (seq, E) rows per batch.
    # TODO(synk): fold this layout change into the BlockSpec index_maps for production.
    tgt_b = jnp.transpose(tgt, (1, 0, 2))          # (B, L, E)
    mem_b = jnp.transpose(memory, (1, 0, 2))       # (B, S, E)

    tl = _query_tile(L)
    grid = (B, pl.cdiv(L, tl))

    sa, ca = params["self_attn"], params["cross_attn"]
    wd = MATMUL_DTYPE
    row = lambda v: v.reshape(1, -1)

    args = (
        tgt_b,                                     # query / residual tile source
        tgt_b,                                     # full tgt (self-attn K/V source)
        mem_b,                                     # full memory (cross-attn K/V source)
        sa["in_w"].astype(wd), row(sa["in_b"]),
        sa["out_w"].astype(wd), row(sa["out_b"]),
        row(params["norm1_g"]), row(params["norm1_b"]),
        ca["in_w"].astype(wd), row(ca["in_b"]),
        ca["out_w"].astype(wd), row(ca["out_b"]),
        row(params["norm2_g"]), row(params["norm2_b"]),
        params["lin1_w"].astype(wd), row(params["lin1_b"]),
        params["lin2_w"].astype(wd), row(params["lin2_b"]),
        row(params["norm3_g"]), row(params["norm3_b"]),
    )

    in_specs = [
        pl.BlockSpec((1, tl, E), lambda b, l: (b, l, 0)),   # (tl, E) query rows
        pl.BlockSpec((1, L, E), lambda b, l: (b, 0, 0)),    # full tgt, per batch
        pl.BlockSpec((1, S, E), lambda b, l: (b, 0, 0)),    # full memory, per batch
    ] + [_resident_spec(a) for a in args[3:]]               # weights / LN params resident

    out = pl.pallas_call(
        functools.partial(_decoder_layer_kernel, nhead=nhead, eps=eps),
        out_shape=jax.ShapeDtypeStruct((B, L, E), tgt.dtype),
        grid=grid,
        in_specs=in_specs,
        out_specs=pl.BlockSpec((1, tl, E), lambda b, l: (b, l, 0)),
        scratch_shapes=[pltpu.VMEM((tl, E), jnp.float32)],  # concatenated head outputs
        compiler_params=pltpu.CompilerParams(
            dimension_semantics=("parallel", "parallel"),
            vmem_limit_bytes=64 * 1024 * 1024),
    )(*args)

    return jnp.transpose(out, (1, 0, 2))           # back to (L, B, E)


# ----------------------------- Param init -----------------------------

def init_params(key, d_model, nhead, dim_feedforward):
    ks = jax.random.split(key, 4)

    def attn_params(k):
        k1, k2 = jax.random.split(k)
        return {
            "in_w": 0.02 * jax.random.normal(k1, (3 * d_model, d_model), jnp.float32),
            "in_b": jnp.zeros((3 * d_model,), jnp.float32),
            "out_w": 0.02 * jax.random.normal(k2, (d_model, d_model), jnp.float32),
            "out_b": jnp.zeros((d_model,), jnp.float32),
        }

    return {
        "self_attn": attn_params(ks[0]),
        "cross_attn": attn_params(ks[1]),
        "lin1_w": 0.02 * jax.random.normal(ks[2], (dim_feedforward, d_model), jnp.float32),
        "lin1_b": jnp.zeros((dim_feedforward,), jnp.float32),
        "lin2_w": 0.02 * jax.random.normal(ks[3], (d_model, dim_feedforward), jnp.float32),
        "lin2_b": jnp.zeros((d_model,), jnp.float32),
        "norm1_g": jnp.ones((d_model,), jnp.float32),
        "norm1_b": jnp.zeros((d_model,), jnp.float32),
        "norm2_g": jnp.ones((d_model,), jnp.float32),
        "norm2_b": jnp.zeros((d_model,), jnp.float32),
        "norm3_g": jnp.ones((d_model,), jnp.float32),
        "norm3_b": jnp.zeros((d_model,), jnp.float32),
    }


# ----------------------------- Main -----------------------------

if __name__ == "__main__":
    d_model = 32
    nhead = 4
    dim_feedforward = 64
    L_tgt, L_mem, B = 8, 8, 2

    key = jax.random.PRNGKey(0)
    k_tgt, k_mem, k_par = jax.random.split(key, 3)

    tgt = jax.random.normal(k_tgt, (L_tgt, B, d_model), jnp.float32)      # (L, B, E)
    memory = jax.random.normal(k_mem, (L_mem, B, d_model), jnp.float32)   # (S, B, E)
    params = init_params(k_par, d_model, nhead, dim_feedforward)

    out = transformer_decoder_layer(tgt, memory, params, nhead)
    out = jax.block_until_ready(out)
    assert out.shape == (L_tgt, B, d_model)
    print("KERNEL_OK")
</pallas_src>

<mosaic_0001>
module attributes {stable_mosaic.version = 11 : i64} {
  func.func @_decoder_layer_kernel(%arg0: i32, %arg1: i32, %arg2: memref<1x8x32xf32, #tpu.memory_space<vmem>>, %arg3: memref<1x8x32xf32, #tpu.memory_space<vmem>>, %arg4: memref<1x8x32xf32, #tpu.memory_space<vmem>>, %arg5: memref<96x32xbf16, #tpu.memory_space<vmem>>, %arg6: memref<1x96xf32, #tpu.memory_space<vmem>>, %arg7: memref<32x32xbf16, #tpu.memory_space<vmem>>, %arg8: memref<1x32xf32, #tpu.memory_space<vmem>>, %arg9: memref<1x32xf32, #tpu.memory_space<vmem>>, %arg10: memref<1x32xf32, #tpu.memory_space<vmem>>, %arg11: memref<96x32xbf16, #tpu.memory_space<vmem>>, %arg12: memref<1x96xf32, #tpu.memory_space<vmem>>, %arg13: memref<32x32xbf16, #tpu.memory_space<vmem>>, %arg14: memref<1x32xf32, #tpu.memory_space<vmem>>, %arg15: memref<1x32xf32, #tpu.memory_space<vmem>>, %arg16: memref<1x32xf32, #tpu.memory_space<vmem>>, %arg17: memref<64x32xbf16, #tpu.memory_space<vmem>>, %arg18: memref<1x64xf32, #tpu.memory_space<vmem>>, %arg19: memref<32x64xbf16, #tpu.memory_space<vmem>>, %arg20: memref<1x32xf32, #tpu.memory_space<vmem>>, %arg21: memref<1x32xf32, #tpu.memory_space<vmem>>, %arg22: memref<1x32xf32, #tpu.memory_space<vmem>>, %arg23: memref<1x8x32xf32, #tpu.memory_space<vmem>>, %arg24: memref<8x32xf32, #tpu.memory_space<vmem>>) attributes {dimension_semantics = [#tpu.dimension_semantics<parallel>, #tpu.dimension_semantics<parallel>], iteration_bounds = array<i64: 2, 1>, scalar_prefetch = 0 : i64, scratch_operands = 1 : i64, tpu.core_type = #tpu.core_type<tc>, window_params = [{transform_indices = @transform_0, window_bounds = array<i64: 1, 8, 32>}, {transform_indices = @transform_1, window_bounds = array<i64: 1, 8, 32>}, {transform_indices = @transform_2, window_bounds = array<i64: 1, 8, 32>}, {pipeline_mode = #tpu.pipeline_mode<synchronous>, transform_indices = @transform_3, window_bounds = array<i64: 96, 32>}, {pipeline_mode = #tpu.pipeline_mode<synchronous>, transform_indices = @transform_4, window_bounds = array<i64: 1, 96>}, {pipeline_mode = #tpu.pipeline_mode<synchronous>, transform_indices = @transform_5, window_bounds = array<i64: 32, 32>}, {pipeline_mode = #tpu.pipeline_mode<synchronous>, transform_indices = @transform_6, window_bounds = array<i64: 1, 32>}, {pipeline_mode = #tpu.pipeline_mode<synchronous>, transform_indices = @transform_7, window_bounds = array<i64: 1, 32>}, {pipeline_mode = #tpu.pipeline_mode<synchronous>, transform_indices = @transform_8, window_bounds = array<i64: 1, 32>}, {pipeline_mode = #tpu.pipeline_mode<synchronous>, transform_indices = @transform_9, window_bounds = array<i64: 96, 32>}, {pipeline_mode = #tpu.pipeline_mode<synchronous>, transform_indices = @transform_10, window_bounds = array<i64: 1, 96>}, {pipeline_mode = #tpu.pipeline_mode<synchronous>, transform_indices = @transform_11, window_bounds = array<i64: 32, 32>}, {pipeline_mode = #tpu.pipeline_mode<synchronous>, transform_indices = @transform_12, window_bounds = array<i64: 1, 32>}, {pipeline_mode = #tpu.pipeline_mode<synchronous>, transform_indices = @transform_13, window_bounds = array<i64: 1, 32>}, {pipeline_mode = #tpu.pipeline_mode<synchronous>, transform_indices = @transform_14, window_bounds = array<i64: 1, 32>}, {pipeline_mode = #tpu.pipeline_mode<synchronous>, transform_indices = @transform_15, window_bounds = array<i64: 64, 32>}, {pipeline_mode = #tpu.pipeline_mode<synchronous>, transform_indices = @transform_16, window_bounds = array<i64: 1, 64>}, {pipeline_mode = #tpu.pipeline_mode<synchronous>, transform_indices = @transform_17, window_bounds = array<i64: 32, 64>}, {pipeline_mode = #tpu.pipeline_mode<synchronous>, transform_indices = @transform_18, window_bounds = array<i64: 1, 32>}, {pipeline_mode = #tpu.pipeline_mode<synchronous>, transform_indices = @transform_19, window_bounds = array<i64: 1, 32>}, {pipeline_mode = #tpu.pipeline_mode<synchronous>, transform_indices = @transform_20, window_bounds = array<i64: 1, 32>}, {transform_indices = @transform_21, window_bounds = array<i64: 1, 8, 32>}]} {
    %c0 = arith.constant 0 : index
    %c0_0 = arith.constant 0 : index
    %c0_1 = arith.constant 0 : index
    %0 = vector.load %arg2[%c0, %c0_0, %c0_1] : memref<1x8x32xf32, #tpu.memory_space<vmem>>, vector<1x8x32xf32>
    %1 = vector.shape_cast %0 : vector<1x8x32xf32> to vector<8x32xf32>
    %c0_2 = arith.constant 0 : index
    %c0_3 = arith.constant 0 : index
    %2 = vector.load %arg5[%c0_2, %c0_3] : memref<96x32xbf16, #tpu.memory_space<vmem>>, vector<96x32xbf16>
    %c0_4 = arith.constant 0 : index
    %c0_5 = arith.constant 0 : index
    %3 = vector.load %arg6[%c0_4, %c0_5] : memref<1x96xf32, #tpu.memory_space<vmem>>, vector<1x96xf32>
    %4 = vector.extract_strided_slice %2 {offsets = [0, 0], sizes = [32, 32], strides = [1, 1]} : vector<96x32xbf16> to vector<32x32xbf16>
    %5 = arith.truncf %1 : vector<8x32xf32> to vector<8x32xbf16>
    %cst = arith.constant dense<0.000000e+00> : vector<8x32xf32>
    %6 = tpu.matmul %5, %4, %cst {dimension_numbers = #tpu.dot_dimension_numbers<[1], [1], [0], [0], [0, 0, 1, 0], [], []>} : vector<8x32xbf16>, vector<32x32xbf16>, vector<8x32xf32> -> vector<8x32xf32>
    %7 = vector.extract_strided_slice %3 {offsets = [0, 0], sizes = [1, 32], strides = [1, 1]} : vector<1x96xf32> to vector<1x32xf32>
    %8 = vector.broadcast %7 : vector<1x32xf32> to vector<8x32xf32>
    %9 = arith.addf %6, %8 : vector<8x32xf32>
    %c0_6 = arith.constant 0 : index
    %c0_7 = arith.constant 0 : index
    %c0_8 = arith.constant 0 : index
    %10 = vector.load %arg3[%c0_6, %c0_7, %c0_8] : memref<1x8x32xf32, #tpu.memory_space<vmem>>, vector<1x8x32xf32>
    %11 = vector.shape_cast %10 : vector<1x8x32xf32> to vector<8x32xf32>
    %12 = vector.extract_strided_slice %2 {offsets = [32, 0], sizes = [64, 32], strides = [1, 1]} : vector<96x32xbf16> to vector<64x32xbf16>
    %13 = arith.truncf %11 : vector<8x32xf32> to vector<8x32xbf16>
    %cst_9 = arith.constant dense<0.000000e+00> : vector<8x64xf32>
    %14 = tpu.matmul %13, %12, %cst_9 {dimension_numbers = #tpu.dot_dimension_numbers<[1], [1], [0], [0], [0, 0, 1, 0], [], []>} : vector<8x32xbf16>, vector<64x32xbf16>, vector<8x64xf32> -> vector<8x64xf32>
    %15 = vector.extract_strided_slice %3 {offsets = [0, 32], sizes = [1, 64], strides = [1, 1]} : vector<1x96xf32> to vector<1x64xf32>
    %16 = vector.broadcast %15 : vector<1x64xf32> to vector<8x64xf32>
    %17 = arith.addf %14, %16 : vector<8x64xf32>
    %18 = vector.extract_strided_slice %17 {offsets = [0, 0], sizes = [8, 32], strides = [1, 1]} : vector<8x64xf32> to vector<8x32xf32>
    %19 = vector.extract_strided_slice %17 {offsets = [0, 32], sizes = [8, 32], strides = [1, 1]} : vector<8x64xf32> to vector<8x32xf32>
    %20 = vector.extract_strided_slice %9 {offsets = [0, 0], sizes = [8, 8], strides = [1, 1]} : vector<8x32xf32> to vector<8x8xf32>
    %cst_10 = arith.constant 0.353553385 : f32
    %21 = vector.broadcast %cst_10 : f32 to vector<8x8xf32>
    %22 = arith.mulf %20, %21 : vector<8x8xf32>
    %23 = arith.truncf %22 : vector<8x8xf32> to vector<8x8xbf16>
    %24 = vector.extract_strided_slice %18 {offsets = [0, 0], sizes = [8, 8], strides = [1, 1]} : vector<8x32xf32> to vector<8x8xf32>
    %25 = arith.truncf %24 : vector<8x8xf32> to vector<8x8xbf16>
    %cst_11 = arith.constant dense<0.000000e+00> : vector<8x8xf32>
    %26 = tpu.matmul %23, %25, %cst_11 {dimension_numbers = #tpu.dot_dimension_numbers<[1], [1], [0], [0], [0, 0, 1, 0], [], []>} : vector<8x8xbf16>, vector<8x8xbf16>, vector<8x8xf32> -> vector<8x8xf32>
    %cst_12 = arith.constant dense<0xFF800000> : vector<8xf32>
    %27 = vector.multi_reduction <maximumf>, %26, %cst_12 [1] : vector<8x8xf32> to vector<8xf32>
    %28 = vector.shape_cast %27 : vector<8xf32> to vector<8x1xf32>
    %29 = vector.broadcast %28 : vector<8x1xf32> to vector<8x8xf32>
    %30 = arith.subf %26, %29 : vector<8x8xf32>
    %31 = math.exp %30 : vector<8x8xf32>
    %cst_13 = arith.constant dense<0.000000e+00> : vector<8xf32>
    %32 = vector.multi_reduction <add>, %31, %cst_13 [1] : vector<8x8xf32> to vector<8xf32>
    %33 = vector.shape_cast %32 : vector<8xf32> to vector<8x1xf32>
    %34 = arith.truncf %31 : vector<8x8xf32> to vector<8x8xbf16>
    %35 = vector.extract_strided_slice %19 {offsets = [0, 0], sizes = [8, 8], strides = [1, 1]} : vector<8x32xf32> to vector<8x8xf32>
    %36 = arith.truncf %35 : vector<8x8xf32> to vector<8x8xbf16>
    %cst_14 = arith.constant dense<0.000000e+00> : vector<8x8xf32>
    %37 = tpu.matmul %34, %36, %cst_14 {dimension_numbers = #tpu.dot_dimension_numbers<[1], [0], [0], [1], [0, 0, 1, 1], [], []>} : vector<8x8xbf16>, vector<8x8xbf16>, vector<8x8xf32> -> vector<8x8xf32>
    %38 = tpu.reciprocal %33 : vector<8x1xf32> -> vector<8x1xf32>
    %39 = vector.broadcast %38 : vector<8x1xf32> to vector<8x8xf32>
    %40 = arith.mulf %37, %39 : vector<8x8xf32>
    %c0_15 = arith.constant 0 : index
    %c0_16 = arith.constant 0 : index
    %41 = vector.load %arg24[%c0_15, %c0_16] : memref<8x32xf32, #tpu.memory_space<vmem>>, vector<8x8xf32>
    tpu.vector_store %arg24[%c0_15, %c0_16], %40 {strides = array<i32>} : memref<8x32xf32, #tpu.memory_space<vmem>>, vector<8x8xf32>,
    %42 = vector.extract_strided_slice %9 {offsets = [0, 8], sizes = [8, 8], strides = [1, 1]} : vector<8x32xf32> to vector<8x8xf32>
    %cst_17 = arith.constant 0.353553385 : f32
    %43 = vector.broadcast %cst_17 : f32 to vector<8x8xf32>
    %44 = arith.mulf %42, %43 : vector<8x8xf32>
    %45 = arith.truncf %44 : vector<8x8xf32> to vector<8x8xbf16>
    %46 = vector.extract_strided_slice %18 {offsets = [0, 8], sizes = [8, 8], strides = [1, 1]} : vector<8x32xf32> to vector<8x8xf32>
    %47 = arith.truncf %46 : vector<8x8xf32> to vector<8x8xbf16>
    %cst_18 = arith.constant dense<0.000000e+00> : vector<8x8xf32>
    %48 = tpu.matmul %45, %47, %cst_18 {dimension_numbers = #tpu.dot_dimension_numbers<[1], [1], [0], [0], [0, 0, 1, 0], [], []>} : vector<8x8xbf16>, vector<8x8xbf16>, vector<8x8xf32> -> vector<8x8xf32>
    %cst_19 = arith.constant dense<0xFF800000> : vector<8xf32>
    %49 = vector.multi_reduction <maximumf>, %48, %cst_19 [1] : vector<8x8xf32> to vector<8xf32>
    %50 = vector.shape_cast %49 : vector<8xf32> to vector<8x1xf32>
    %51 = vector.broadcast %50 : vector<8x1xf32> to vector<8x8xf32>
    %52 = arith.subf %48, %51 : vector<8x8xf32>
    %53 = math.exp %52 : vector<8x8xf32>
    %cst_20 = arith.constant dense<0.000000e+00> : vector<8xf32>
    %54 = vector.multi_reduction <add>, %53, %cst_20 [1] : vector<8x8xf32> to vector<8xf32>
    %55 = vector.shape_cast %54 : vector<8xf32> to vector<8x1xf32>
    %56 = arith.truncf %53 : vector<8x8xf32> to vector<8x8xbf16>
    %57 = vector.extract_strided_slice %19 {offsets = [0, 8], sizes = [8, 8], strides = [1, 1]} : vector<8x32xf32> to vector<8x8xf32>
    %58 = arith.truncf %57 : vector<8x8xf32> to vector<8x8xbf16>
    %cst_21 = arith.constant dense<0.000000e+00> : vector<8x8xf32>
    %59 = tpu.matmul %56, %58, %cst_21 {dimension_numbers = #tpu.dot_dimension_numbers<[1], [0], [0], [1], [0, 0, 1, 1], [], []>} : vector<8x8xbf16>, vector<8x8xbf16>, vector<8x8xf32> -> vector<8x8xf32>
    %60 = tpu.reciprocal %55 : vector<8x1xf32> -> vector<8x1xf32>
    %61 = vector.broadcast %60 : vector<8x1xf32> to vector<8x8xf32>
    %62 = arith.mulf %59, %61 : vector<8x8xf32>
    %c0_22 = arith.constant 0 : index
    %c8 = arith.constant 8 : index
    %63 = vector.load %arg24[%c0_22, %c8] : memref<8x32xf32, #tpu.memory_space<vmem>>, vector<8x8xf32>
    tpu.vector_store %arg24[%c0_22, %c8], %62 {strides = array<i32>} : memref<8x32xf32, #tpu.memory_space<vmem>>, vector<8x8xf32>,
    %64 = vector.extract_strided_slice %9 {offsets = [0, 16], sizes = [8, 8], strides = [1, 1]} : vector<8x32xf32> to vector<8x8xf32>
    %cst_23 = arith.constant 0.353553385 : f32
    %65 = vector.broadcast %cst_23 : f32 to vector<8x8xf32>
    %66 = arith.mulf %64, %65 : vector<8x8xf32>
    %67 = arith.truncf %66 : vector<8x8xf32> to vector<8x8xbf16>
    %68 = vector.extract_strided_slice %18 {offsets = [0, 16], sizes = [8, 8], strides = [1, 1]} : vector<8x32xf32> to vector<8x8xf32>
    %69 = arith.truncf %68 : vector<8x8xf32> to vector<8x8xbf16>
    %cst_24 = arith.constant dense<0.000000e+00> : vector<8x8xf32>
    %70 = tpu.matmul %67, %69, %cst_24 {dimension_numbers = #tpu.dot_dimension_numbers<[1], [1], [0], [0], [0, 0, 1, 0], [], []>} : vector<8x8xbf16>, vector<8x8xbf16>, vector<8x8xf32> -> vector<8x8xf32>
    %cst_25 = arith.constant dense<0xFF800000> : vector<8xf32>
    %71 = vector.multi_reduction <maximumf>, %70, %cst_25 [1] : vector<8x8xf32> to vector<8xf32>
    %72 = vector.shape_cast %71 : vector<8xf32> to vector<8x1xf32>
    %73 = vector.broadcast %72 : vector<8x1xf32> to vector<8x8xf32>
    %74 = arith.subf %70, %73 : vector<8x8xf32>
    %75 = math.exp %74 : vector<8x8xf32>
    %cst_26 = arith.constant dense<0.000000e+00> : vector<8xf32>
    %76 = vector.multi_reduction <add>, %75, %cst_26 [1] : vector<8x8xf32> to vector<8xf32>
    %77 = vector.shape_cast %76 : vector<8xf32> to vector<8x1xf32>
    %78 = arith.truncf %75 : vector<8x8xf32> to vector<8x8xbf16>
    %79 = vector.extract_strided_slice %19 {offsets = [0, 16], sizes = [8, 8], strides = [1, 1]} : vector<8x32xf32> to vector<8x8xf32>
    %80 = arith.truncf %79 : vector<8x8xf32> to vector<8x8xbf16>
    %cst_27 = arith.constant dense<0.000000e+00> : vector<8x8xf32>
    %81 = tpu.matmul %78, %80, %cst_27 {dimension_numbers = #tpu.dot_dimension_numbers<[1], [0], [0], [1], [0, 0, 1, 1], [], []>} : vector<8x8xbf16>, vector<8x8xbf16>, vector<8x8xf32> -> vector<8x8xf32>
    %82 = tpu.reciprocal %77 : vector<8x1xf32> -> vector<8x1xf32>
    %83 = vector.broadcast %82 : vector<8x1xf32> to vector<8x8xf32>
    %84 = arith.mulf %81, %83 : vector<8x8xf32>
    %c0_28 = arith.constant 0 : index
    %c16 = arith.constant 16 : index
    %85 = vector.load %arg24[%c0_28, %c16] : memref<8x32xf32, #tpu.memory_space<vmem>>, vector<8x8xf32>
    tpu.vector_store %arg24[%c0_28, %c16], %84 {strides = array<i32>} : memref<8x32xf32, #tpu.memory_space<vmem>>, vector<8x8xf32>,
    %86 = vector.extract_strided_slice %9 {offsets = [0, 24], sizes = [8, 8], strides = [1, 1]} : vector<8x32xf32> to vector<8x8xf32>
    %cst_29 = arith.constant 0.353553385 : f32
    %87 = vector.broadcast %cst_29 : f32 to vector<8x8xf32>
    %88 = arith.mulf %86, %87 : vector<8x8xf32>
    %89 = arith.truncf %88 : vector<8x8xf32> to vector<8x8xbf16>
    %90 = vector.extract_strided_slice %18 {offsets = [0, 24], sizes = [8, 8], strides = [1, 1]} : vector<8x32xf32> to vector<8x8xf32>
    %91 = arith.truncf %90 : vector<8x8xf32> to vector<8x8xbf16>
    %cst_30 = arith.constant dense<0.000000e+00> : vector<8x8xf32>
    %92 = tpu.matmul %89, %91, %cst_30 {dimension_numbers = #tpu.dot_dimension_numbers<[1], [1], [0], [0], [0, 0, 1, 0], [], []>} : vector<8x8xbf16>, vector<8x8xbf16>, vector<8x8xf32> -> vector<8x8xf32>
    %cst_31 = arith.constant dense<0xFF800000> : vector<8xf32>
    %93 = vector.multi_reduction <maximumf>, %92, %cst_31 [1] : vector<8x8xf32> to vector<8xf32>
    %94 = vector.shape_cast %93 : vector<8xf32> to vector<8x1xf32>
    %95 = vector.broadcast %94 : vector<8x1xf32> to vector<8x8xf32>
    %96 = arith.subf %92, %95 : vector<8x8xf32>
    %97 = math.exp %96 : vector<8x8xf32>
    %cst_32 = arith.constant dense<0.000000e+00> : vector<8xf32>
    %98 = vector.multi_reduction <add>, %97, %cst_32 [1] : vector<8x8xf32> to vector<8xf32>
    %99 = vector.shape_cast %98 : vector<8xf32> to vector<8x1xf32>
    %100 = arith.truncf %97 : vector<8x8xf32> to vector<8x8xbf16>
    %101 = vector.extract_strided_slice %19 {offsets = [0, 24], sizes = [8, 8], strides = [1, 1]} : vector<8x32xf32> to vector<8x8xf32>
    %102 = arith.truncf %101 : vector<8x8xf32> to vector<8x8xbf16>
    %cst_33 = arith.constant dense<0.000000e+00> : vector<8x8xf32>
    %103 = tpu.matmul %100, %102, %cst_33 {dimension_numbers = #tpu.dot_dimension_numbers<[1], [0], [0], [1], [0, 0, 1, 1], [], []>} : vector<8x8xbf16>, vector<8x8xbf16>, vector<8x8xf32> -> vector<8x8xf32>
    %104 = tpu.reciprocal %99 : vector<8x1xf32> -> vector<8x1xf32>
    %105 = vector.broadcast %104 : vector<8x1xf32> to vector<8x8xf32>
    %106 = arith.mulf %103, %105 : vector<8x8xf32>
    %c0_34 = arith.constant 0 : index
    %c24 = arith.constant 24 : index
    %107 = vector.load %arg24[%c0_34, %c24] : memref<8x32xf32, #tpu.memory_space<vmem>>, vector<8x8xf32>
    tpu.vector_store %arg24[%c0_34, %c24], %106 {strides = array<i32>} : memref<8x32xf32, #tpu.memory_space<vmem>>, vector<8x8xf32>,
    %c0_35 = arith.constant 0 : index
    %c0_36 = arith.constant 0 : index
    %108 = vector.load %arg24[%c0_35, %c0_36] : memref<8x32xf32, #tpu.memory_space<vmem>>, vector<8x32xf32>
    %c0_37 = arith.constant 0 : index
    %c0_38 = arith.constant 0 : index
    %109 = vector.load %arg7[%c0_37, %c0_38] : memref<32x32xbf16, #tpu.memory_space<vmem>>, vector<32x32xbf16>
    %110 = arith.truncf %108 : vector<8x32xf32> to vector<8x32xbf16>
    %cst_39 = arith.constant dense<0.000000e+00> : vector<8x32xf32>
    %111 = tpu.matmul %110, %109, %cst_39 {dimension_numbers = #tpu.dot_dimension_numbers<[1], [1], [0], [0], [0, 0, 1, 0], [], []>} : vector<8x32xbf16>, vector<32x32xbf16>, vector<8x32xf32> -> vector<8x32xf32>
    %c0_40 = arith.constant 0 : index
    %c0_41 = arith.constant 0 : index
    %112 = vector.load %arg8[%c0_40, %c0_41] : memref<1x32xf32, #tpu.memory_space<vmem>>, vector<1x32xf32>
    %113 = vector.broadcast %112 : vector<1x32xf32> to vector<8x32xf32>
    %114 = arith.addf %111, %113 : vector<8x32xf32>
    %115 = arith.addf %114, %1 : vector<8x32xf32>
    %c0_42 = arith.constant 0 : index
    %c0_43 = arith.constant 0 : index
    %116 = vector.load %arg9[%c0_42, %c0_43] : memref<1x32xf32, #tpu.memory_space<vmem>>, vector<1x32xf32>
    %c0_44 = arith.constant 0 : index
    %c0_45 = arith.constant 0 : index
    %117 = vector.load %arg10[%c0_44, %c0_45] : memref<1x32xf32, #tpu.memory_space<vmem>>, vector<1x32xf32>
    %cst_46 = arith.constant dense<0.000000e+00> : vector<8xf32>
    %118 = vector.multi_reduction <add>, %115, %cst_46 [1] : vector<8x32xf32> to vector<8xf32>
    %119 = vector.shape_cast %118 : vector<8xf32> to vector<8x1xf32>
    %cst_47 = arith.constant 3.200000e+01 : f32
    %120 = vector.broadcast %cst_47 : f32 to vector<8x1xf32>
    %121 = arith.divf %119, %120 : vector<8x1xf32>
    %122 = vector.broadcast %121 : vector<8x1xf32> to vector<8x32xf32>
    %123 = arith.subf %115, %122 : vector<8x32xf32>
    %124 = arith.mulf %123, %123 : vector<8x32xf32>
    %cst_48 = arith.constant dense<0.000000e+00> : vector<8xf32>
    %125 = vector.multi_reduction <add>, %124, %cst_48 [1] : vector<8x32xf32> to vector<8xf32>
    %126 = vector.shape_cast %125 : vector<8xf32> to vector<8x1xf32>
    %cst_49 = arith.constant 3.200000e+01 : f32
    %127 = vector.broadcast %cst_49 : f32 to vector<8x1xf32>
    %128 = arith.divf %126, %127 : vector<8x1xf32>
    %129 = vector.broadcast %121 : vector<8x1xf32> to vector<8x32xf32>
    %130 = arith.subf %115, %129 : vector<8x32xf32>
    %cst_50 = arith.constant 9.99999974E-6 : f32
    %131 = vector.broadcast %cst_50 : f32 to vector<8x1xf32>
    %132 = arith.addf %128, %131 : vector<8x1xf32>
    %133 = math.rsqrt %132 : vector<8x1xf32>
    %134 = vector.broadcast %133 : vector<8x1xf32> to vector<8x32xf32>
    %135 = arith.mulf %130, %134 : vector<8x32xf32>
    %136 = vector.broadcast %116 : vector<1x32xf32> to vector<8x32xf32>
    %137 = arith.mulf %135, %136 : vector<8x32xf32>
    %138 = vector.broadcast %117 : vector<1x32xf32> to vector<8x32xf32>
    %139 = arith.addf %137, %138 : vector<8x32xf32>
    %c0_51 = arith.constant 0 : index
    %c0_52 = arith.constant 0 : index
    %140 = vector.load %arg11[%c0_51, %c0_52] : memref<96x32xbf16, #tpu.memory_space<vmem>>, vector<96x32xbf16>
    %c0_53 = arith.constant 0 : index
    %c0_54 = arith.constant 0 : index
    %141 = vector.load %arg12[%c0_53, %c0_54] : memref<1x96xf32, #tpu.memory_space<vmem>>, vector<1x96xf32>
    %142 = vector.extract_strided_slice %140 {offsets = [0, 0], sizes = [32, 32], strides = [1, 1]} : vector<96x32xbf16> to vector<32x32xbf16>
    %143 = arith.truncf %139 : vector<8x32xf32> to vector<8x32xbf16>
    %cst_55 = arith.constant dense<0.000000e+00> : vector<8x32xf32>
    %144 = tpu.matmul %143, %142, %cst_55 {dimension_numbers = #tpu.dot_dimension_numbers<[1], [1], [0], [0], [0, 0, 1, 0], [], []>} : vector<8x32xbf16>, vector<32x32xbf16>, vector<8x32xf32> -> vector<8x32xf32>
    %145 = vector.extract_strided_slice %141 {offsets = [0, 0], sizes = [1, 32], strides = [1, 1]} : vector<1x96xf32> to vector<1x32xf32>
    %146 = vector.broadcast %145 : vector<1x32xf32> to vector<8x32xf32>
    %147 = arith.addf %144, %146 : vector<8x32xf32>
    %c0_56 = arith.constant 0 : index
    %c0_57 = arith.constant 0 : index
    %c0_58 = arith.constant 0 : index
    %148 = vector.load %arg4[%c0_56, %c0_57, %c0_58] : memref<1x8x32xf32, #tpu.memory_space<vmem>>, vector<1x8x32xf32>
    %149 = vector.shape_cast %148 : vector<1x8x32xf32> to vector<8x32xf32>
    %150 = vector.extract_strided_slice %140 {offsets = [32, 0], sizes = [64, 32], strides = [1, 1]} : vector<96x32xbf16> to vector<64x32xbf16>
    %151 = arith.truncf %149 : vector<8x32xf32> to vector<8x32xbf16>
    %cst_59 = arith.constant dense<0.000000e+00> : vector<8x64xf32>
    %152 = tpu.matmul %151, %150, %cst_59 {dimension_numbers = #tpu.dot_dimension_numbers<[1], [1], [0], [0], [0, 0, 1, 0], [], []>} : vector<8x32xbf16>, vector<64x32xbf16>, vector<8x64xf32> -> vector<8x64xf32>
    %153 = vector.extract_strided_slice %141 {offsets = [0, 32], sizes = [1, 64], strides = [1, 1]} : vector<1x96xf32> to vector<1x64xf32>
    %154 = vector.broadcast %153 : vector<1x64xf32> to vector<8x64xf32>
    %155 = arith.addf %152, %154 : vector<8x64xf32>
    %156 = vector.extract_strided_slice %155 {offsets = [0, 0], sizes = [8, 32], strides = [1, 1]} : vector<8x64xf32> to vector<8x32xf32>
    %157 = vector.extract_strided_slice %155 {offsets = [0, 32], sizes = [8, 32], strides = [1, 1]} : vector<8x64xf32> to vector<8x32xf32>
    %158 = vector.extract_strided_slice %147 {offsets = [0, 0], sizes = [8, 8], strides = [1, 1]} : vector<8x32xf32> to vector<8x8xf32>
    %cst_60 = arith.constant 0.353553385 : f32
    %159 = vector.broadcast %cst_60 : f32 to vector<8x8xf32>
    %160 = arith.mulf %158, %159 : vector<8x8xf32>
    %161 = arith.truncf %160 : vector<8x8xf32> to vector<8x8xbf16>
    %162 = vector.extract_strided_slice %156 {offsets = [0, 0], sizes = [8, 8], strides = [1, 1]} : vector<8x32xf32> to vector<8x8xf32>
    %163 = arith.truncf %162 : vector<8x8xf32> to vector<8x8xbf16>
    %cst_61 = arith.constant dense<0.000000e+00> : vector<8x8xf32>
    %164 = tpu.matmul %161, %163, %cst_61 {dimension_numbers = #tpu.dot_dimension_numbers<[1], [1], [0], [0], [0, 0, 1, 0], [], []>} : vector<8x8xbf16>, vector<8x8xbf16>, vector<8x8xf32> -> vector<8x8xf32>
    %cst_62 = arith.constant dense<0xFF800000> : vector<8xf32>
    %165 = vector.multi_reduction <maximumf>, %164, %cst_62 [1] : vector<8x8xf32> to vector<8xf32>
    %166 = vector.shape_cast %165 : vector<8xf32> to vector<8x1xf32>
    %167 = vector.broadcast %166 : vector<8x1xf32> to vector<8x8xf32>
    %168 = arith.subf %164, %167 : vector<8x8xf32>
    %169 = math.exp %168 : vector<8x8xf32>
    %cst_63 = arith.constant dense<0.000000e+00> : vector<8xf32>
    %170 = vector.multi_reduction <add>, %169, %cst_63 [1] : vector<8x8xf32> to vector<8xf32>
    %171 = vector.shape_cast %170 : vector<8xf32> to vector<8x1xf32>
    %172 = arith.truncf %169 : vector<8x8xf32> to vector<8x8xbf16>
    %173 = vector.extract_strided_slice %157 {offsets = [0, 0], sizes = [8, 8], strides = [1, 1]} : vector<8x32xf32> to vector<8x8xf32>
    %174 = arith.truncf %173 : vector<8x8xf32> to vector<8x8xbf16>
    %cst_64 = arith.constant dense<0.000000e+00> : vector<8x8xf32>
    %175 = tpu.matmul %172, %174, %cst_64 {dimension_numbers = #tpu.dot_dimension_numbers<[1], [0], [0], [1], [0, 0, 1, 1], [], []>} : vector<8x8xbf16>, vector<8x8xbf16>, vector<8x8xf32> -> vector<8x8xf32>
    %176 = tpu.reciprocal %171 : vector<8x1xf32> -> vector<8x1xf32>
    %177 = vector.broadcast %176 : vector<8x1xf32> to vector<8x8xf32>
    %178 = arith.mulf %175, %177 : vector<8x8xf32>
    %c0_65 = arith.constant 0 : index
    %c0_66 = arith.constant 0 : index
    %179 = vector.load %arg24[%c0_65, %c0_66] : memref<8x32xf32, #tpu.memory_space<vmem>>, vector<8x8xf32>
    tpu.vector_store %arg24[%c0_65, %c0_66], %178 {strides = array<i32>} : memref<8x32xf32, #tpu.memory_space<vmem>>, vector<8x8xf32>,
    %180 = vector.extract_strided_slice %147 {offsets = [0, 8], sizes = [8, 8], strides = [1, 1]} : vector<8x32xf32> to vector<8x8xf32>
    %cst_67 = arith.constant 0.353553385 : f32
    %181 = vector.broadcast %cst_67 : f32 to vector<8x8xf32>
    %182 = arith.mulf %180, %181 : vector<8x8xf32>
    %183 = arith.truncf %182 : vector<8x8xf32> to vector<8x8xbf16>
    %184 = vector.extract_strided_slice %156 {offsets = [0, 8], sizes = [8, 8], strides = [1, 1]} : vector<8x32xf32> to vector<8x8xf32>
    %185 = arith.truncf %184 : vector<8x8xf32> to vector<8x8xbf16>
    %cst_68 = arith.constant dense<0.000000e+00> : vector<8x8xf32>
    %186 = tpu.matmul %183, %185, %cst_68 {dimension_numbers = #tpu.dot_dimension_numbers<[1], [1], [0], [0], [0, 0, 1, 0], [], []>} : vector<8x8xbf16>, vector<8x8xbf16>, vector<8x8xf32> -> vector<8x8xf32>
    %cst_69 = arith.constant dense<0xFF800000> : vector<8xf32>
    %187 = vector.multi_reduction <maximumf>, %186, %cst_69 [1] : vector<8x8xf32> to vector<8xf32>
    %188 = vector.shape_cast %187 : vector<8xf32> to vector<8x1xf32>
    %189 = vector.broadcast %188 : vector<8x1xf32> to vector<8x8xf32>
    %190 = arith.subf %186, %189 : vector<8x8xf32>
    %191 = math.exp %190 : vector<8x8xf32>
    %cst_70 = arith.constant dense<0.000000e+00> : vector<8xf32>
    %192 = vector.multi_reduction <add>, %191, %cst_70 [1] : vector<8x8xf32> to vector<8xf32>
    %193 = vector.shape_cast %192 : vector<8xf32> to vector<8x1xf32>
    %194 = arith.truncf %191 : vector<8x8xf32> to vector<8x8xbf16>
    %195 = vector.extract_strided_slice %157 {offsets = [0, 8], sizes = [8, 8], strides = [1, 1]} : vector<8x32xf32> to vector<8x8xf32>
    %196 = arith.truncf %195 : vector<8x8xf32> to vector<8x8xbf16>
    %cst_71 = arith.constant dense<0.000000e+00> : vector<8x8xf32>
    %197 = tpu.matmul %194, %196, %cst_71 {dimension_numbers = #tpu.dot_dimension_numbers<[1], [0], [0], [1], [0, 0, 1, 1], [], []>} : vector<8x8xbf16>, vector<8x8xbf16>, vector<8x8xf32> -> vector<8x8xf32>
    %198 = tpu.reciprocal %193 : vector<8x1xf32> -> vector<8x1xf32>
    %199 = vector.broadcast %198 : vector<8x1xf32> to vector<8x8xf32>
    %200 = arith.mulf %197, %199 : vector<8x8xf32>
    %c0_72 = arith.constant 0 : index
    %c8_73 = arith.constant 8 : index
    %201 = vector.load %arg24[%c0_72, %c8_73] : memref<8x32xf32, #tpu.memory_space<vmem>>, vector<8x8xf32>
    tpu.vector_store %arg24[%c0_72, %c8_73], %200 {strides = array<i32>} : memref<8x32xf32, #tpu.memory_space<vmem>>, vector<8x8xf32>,
    %202 = vector.extract_strided_slice %147 {offsets = [0, 16], sizes = [8, 8], strides = [1, 1]} : vector<8x32xf32> to vector<8x8xf32>
    %cst_74 = arith.constant 0.353553385 : f32
    %203 = vector.broadcast %cst_74 : f32 to vector<8x8xf32>
    %204 = arith.mulf %202, %203 : vector<8x8xf32>
    %205 = arith.truncf %204 : vector<8x8xf32> to vector<8x8xbf16>
    %206 = vector.extract_strided_slice %156 {offsets = [0, 16], sizes = [8, 8], strides = [1, 1]} : vector<8x32xf32> to vector<8x8xf32>
    %207 = arith.truncf %206 : vector<8x8xf32> to vector<8x8xbf16>
    %cst_75 = arith.constant dense<0.000000e+00> : vector<8x8xf32>
    %208 = tpu.matmul %205, %207, %cst_75 {dimension_numbers = #tpu.dot_dimension_numbers<[1], [1], [0], [0], [0, 0, 1, 0], [], []>} : vector<8x8xbf16>, vector<8x8xbf16>, vector<8x8xf32> -> vector<8x8xf32>
    %cst_76 = arith.constant dense<0xFF800000> : vector<8xf32>
    %209 = vector.multi_reduction <maximumf>, %208, %cst_76 [1] : vector<8x8xf32> to vector<8xf32>
    %210 = vector.shape_cast %209 : vector<8xf32> to vector<8x1xf32>
    %211 = vector.broadcast %210 : vector<8x1xf32> to vector<8x8xf32>
    %212 = arith.subf %208, %211 : vector<8x8xf32>
    %213 = math.exp %212 : vector<8x8xf32>
    %cst_77 = arith.constant dense<0.000000e+00> : vector<8xf32>
    %214 = vector.multi_reduction <add>, %213, %cst_77 [1] : vector<8x8xf32> to vector<8xf32>
    %215 = vector.shape_cast %214 : vector<8xf32> to vector<8x1xf32>
    %216 = arith.truncf %213 : vector<8x8xf32> to vector<8x8xbf16>
    %217 = vector.extract_strided_slice %157 {offsets = [0, 16], sizes = [8, 8], strides = [1, 1]} : vector<8x32xf32> to vector<8x8xf32>
    %218 = arith.truncf %217 : vector<8x8xf32> to vector<8x8xbf16>
    %cst_78 = arith.constant dense<0.000000e+00> : vector<8x8xf32>
    %219 = tpu.matmul %216, %218, %cst_78 {dimension_numbers = #tpu.dot_dimension_numbers<[1], [0], [0], [1], [0, 0, 1, 1], [], []>} : vector<8x8xbf16>, vector<8x8xbf16>, vector<8x8xf32> -> vector<8x8xf32>
    %220 = tpu.reciprocal %215 : vector<8x1xf32> -> vector<8x1xf32>
    %221 = vector.broadcast %220 : vector<8x1xf32> to vector<8x8xf32>
    %222 = arith.mulf %219, %221 : vector<8x8xf32>
    %c0_79 = arith.constant 0 : index
    %c16_80 = arith.constant 16 : index
    %223 = vector.load %arg24[%c0_79, %c16_80] : memref<8x32xf32, #tpu.memory_space<vmem>>, vector<8x8xf32>
    tpu.vector_store %arg24[%c0_79, %c16_80], %222 {strides = array<i32>} : memref<8x32xf32, #tpu.memory_space<vmem>>, vector<8x8xf32>,
    %224 = vector.extract_strided_slice %147 {offsets = [0, 24], sizes = [8, 8], strides = [1, 1]} : vector<8x32xf32> to vector<8x8xf32>
    %cst_81 = arith.constant 0.353553385 : f32
    %225 = vector.broadcast %cst_81 : f32 to vector<8x8xf32>
    %226 = arith.mulf %224, %225 : vector<8x8xf32>
    %227 = arith.truncf %226 : vector<8x8xf32> to vector<8x8xbf16>
    %228 = vector.extract_strided_slice %156 {offsets = [0, 24], sizes = [8, 8], strides = [1, 1]} : vector<8x32xf32> to vector<8x8xf32>
    %229 = arith.truncf %228 : vector<8x8xf32> to vector<8x8xbf16>
    %cst_82 = arith.constant dense<0.000000e+00> : vector<8x8xf32>
    %230 = tpu.matmul %227, %229, %cst_82 {dimension_numbers = #tpu.dot_dimension_numbers<[1], [1], [0], [0], [0, 0, 1, 0], [], []>} : vector<8x8xbf16>, vector<8x8xbf16>, vector<8x8xf32> -> vector<8x8xf32>
    %cst_83 = arith.constant dense<0xFF800000> : vector<8xf32>
    %231 = vector.multi_reduction <maximumf>, %230, %cst_83 [1] : vector<8x8xf32> to vector<8xf32>
    %232 = vector.shape_cast %231 : vector<8xf32> to vector<8x1xf32>
    %233 = vector.broadcast %232 : vector<8x1xf32> to vector<8x8xf32>
    %234 = arith.subf %230, %233 : vector<8x8xf32>
    %235 = math.exp %234 : vector<8x8xf32>
    %cst_84 = arith.constant dense<0.000000e+00> : vector<8xf32>
    %236 = vector.multi_reduction <add>, %235, %cst_84 [1] : vector<8x8xf32> to vector<8xf32>
    %237 = vector.shape_cast %236 : vector<8xf32> to vector<8x1xf32>
    %238 = arith.truncf %235 : vector<8x8xf32> to vector<8x8xbf16>
    %239 = vector.extract_strided_slice %157 {offsets = [0, 24], sizes = [8, 8], strides = [1, 1]} : vector<8x32xf32> to vector<8x8xf32>
    %240 = arith.truncf %239 : vector<8x8xf32> to vector<8x8xbf16>
    %cst_85 = arith.constant dense<0.000000e+00> : vector<8x8xf32>
    %241 = tpu.matmul %238, %240, %cst_85 {dimension_numbers = #tpu.dot_dimension_numbers<[1], [0], [0], [1], [0, 0, 1, 1], [], []>} : vector<8x8xbf16>, vector<8x8xbf16>, vector<8x8xf32> -> vector<8x8xf32>
    %242 = tpu.reciprocal %237 : vector<8x1xf32> -> vector<8x1xf32>
    %243 = vector.broadcast %242 : vector<8x1xf32> to vector<8x8xf32>
    %244 = arith.mulf %241, %243 : vector<8x8xf32>
    %c0_86 = arith.constant 0 : index
    %c24_87 = arith.constant 24 : index
    %245 = vector.load %arg24[%c0_86, %c24_87] : memref<8x32xf32, #tpu.memory_space<vmem>>, vector<8x8xf32>
    tpu.vector_store %arg24[%c0_86, %c24_87], %244 {strides = array<i32>} : memref<8x32xf32, #tpu.memory_space<vmem>>, vector<8x8xf32>,
    %c0_88 = arith.constant 0 : index
    %c0_89 = arith.constant 0 : index
    %246 = vector.load %arg24[%c0_88, %c0_89] : memref<8x32xf32, #tpu.memory_space<vmem>>, vector<8x32xf32>
    %c0_90 = arith.constant 0 : index
    %c0_91 = arith.constant 0 : index
    %247 = vector.load %arg13[%c0_90, %c0_91] : memref<32x32xbf16, #tpu.memory_space<vmem>>, vector<32x32xbf16>
    %248 = arith.truncf %246 : vector<8x32xf32> to vector<8x32xbf16>
    %cst_92 = arith.constant dense<0.000000e+00> : vector<8x32xf32>
    %249 = tpu.matmul %248, %247, %cst_92 {dimension_numbers = #tpu.dot_dimension_numbers<[1], [1], [0], [0], [0, 0, 1, 0], [], []>} : vector<8x32xbf16>, vector<32x32xbf16>, vector<8x32xf32> -> vector<8x32xf32>
    %c0_93 = arith.constant 0 : index
    %c0_94 = arith.constant 0 : index
    %250 = vector.load %arg14[%c0_93, %c0_94] : memref<1x32xf32, #tpu.memory_space<vmem>>, vector<1x32xf32>
    %251 = vector.broadcast %250 : vector<1x32xf32> to vector<8x32xf32>
    %252 = arith.addf %249, %251 : vector<8x32xf32>
    %253 = arith.addf %252, %139 : vector<8x32xf32>
    %c0_95 = arith.constant 0 : index
    %c0_96 = arith.constant 0 : index
    %254 = vector.load %arg15[%c0_95, %c0_96] : memref<1x32xf32, #tpu.memory_space<vmem>>, vector<1x32xf32>
    %c0_97 = arith.constant 0 : index
    %c0_98 = arith.constant 0 : index
    %255 = vector.load %arg16[%c0_97, %c0_98] : memref<1x32xf32, #tpu.memory_space<vmem>>, vector<1x32xf32>
    %cst_99 = arith.constant dense<0.000000e+00> : vector<8xf32>
    %256 = vector.multi_reduction <add>, %253, %cst_99 [1] : vector<8x32xf32> to vector<8xf32>
    %257 = vector.shape_cast %256 : vector<8xf32> to vector<8x1xf32>
    %cst_100 = arith.constant 3.200000e+01 : f32
    %258 = vector.broadcast %cst_100 : f32 to vector<8x1xf32>
    %259 = arith.divf %257, %258 : vector<8x1xf32>
    %260 = vector.broadcast %259 : vector<8x1xf32> to vector<8x32xf32>
    %261 = arith.subf %253, %260 : vector<8x32xf32>
    %262 = arith.mulf %261, %261 : vector<8x32xf32>
    %cst_101 = arith.constant dense<0.000000e+00> : vector<8xf32>
    %263 = vector.multi_reduction <add>, %262, %cst_101 [1] : vector<8x32xf32> to vector<8xf32>
    %264 = vector.shape_cast %263 : vector<8xf32> to vector<8x1xf32>
    %cst_102 = arith.constant 3.200000e+01 : f32
    %265 = vector.broadcast %cst_102 : f32 to vector<8x1xf32>
    %266 = arith.divf %264, %265 : vector<8x1xf32>
    %267 = vector.broadcast %259 : vector<8x1xf32> to vector<8x32xf32>
    %268 = arith.subf %253, %267 : vector<8x32xf32>
    %cst_103 = arith.constant 9.99999974E-6 : f32
    %269 = vector.broadcast %cst_103 : f32 to vector<8x1xf32>
    %270 = arith.addf %266, %269 : vector<8x1xf32>
    %271 = math.rsqrt %270 : vector<8x1xf32>
    %272 = vector.broadcast %271 : vector<8x1xf32> to vector<8x32xf32>
    %273 = arith.mulf %268, %272 : vector<8x32xf32>
    %274 = vector.broadcast %254 : vector<1x32xf32> to vector<8x32xf32>
    %275 = arith.mulf %273, %274 : vector<8x32xf32>
    %276 = vector.broadcast %255 : vector<1x32xf32> to vector<8x32xf32>
    %277 = arith.addf %275, %276 : vector<8x32xf32>
    %c0_104 = arith.constant 0 : index
    %c0_105 = arith.constant 0 : index
    %278 = vector.load %arg17[%c0_104, %c0_105] : memref<64x32xbf16, #tpu.memory_space<vmem>>, vector<64x32xbf16>
    %279 = arith.truncf %277 : vector<8x32xf32> to vector<8x32xbf16>
    %cst_106 = arith.constant dense<0.000000e+00> : vector<8x64xf32>
    %280 = tpu.matmul %279, %278, %cst_106 {dimension_numbers = #tpu.dot_dimension_numbers<[1], [1], [0], [0], [0, 0, 1, 0], [], []>} : vector<8x32xbf16>, vector<64x32xbf16>, vector<8x64xf32> -> vector<8x64xf32>
    %c0_107 = arith.constant 0 : index
    %c0_108 = arith.constant 0 : index
    %281 = vector.load %arg18[%c0_107, %c0_108] : memref<1x64xf32, #tpu.memory_space<vmem>>, vector<1x64xf32>
    %282 = vector.broadcast %281 : vector<1x64xf32> to vector<8x64xf32>
    %283 = arith.addf %280, %282 : vector<8x64xf32>
    %cst_109 = arith.constant 0.000000e+00 : f32
    %284 = vector.broadcast %cst_109 : f32 to vector<8x64xf32>
    %285 = arith.maximumf %283, %284 : vector<8x64xf32>
    %c0_110 = arith.constant 0 : index
    %c0_111 = arith.constant 0 : index
    %286 = vector.load %arg19[%c0_110, %c0_111] : memref<32x64xbf16, #tpu.memory_space<vmem>>, vector<32x64xbf16>
    %287 = arith.truncf %285 : vector<8x64xf32> to vector<8x64xbf16>
    %cst_112 = arith.constant dense<0.000000e+00> : vector<8x32xf32>
    %288 = tpu.matmul %287, %286, %cst_112 {dimension_numbers = #tpu.dot_dimension_numbers<[1], [1], [0], [0], [0, 0, 1, 0], [], []>} : vector<8x64xbf16>, vector<32x64xbf16>, vector<8x32xf32> -> vector<8x32xf32>
    %c0_113 = arith.constant 0 : index
    %c0_114 = arith.constant 0 : index
    %289 = vector.load %arg20[%c0_113, %c0_114] : memref<1x32xf32, #tpu.memory_space<vmem>>, vector<1x32xf32>
    %290 = vector.broadcast %289 : vector<1x32xf32> to vector<8x32xf32>
    %291 = arith.addf %288, %290 : vector<8x32xf32>
    %292 = arith.addf %291, %277 : vector<8x32xf32>
    %c0_115 = arith.constant 0 : index
    %c0_116 = arith.constant 0 : index
    %293 = vector.load %arg21[%c0_115, %c0_116] : memref<1x32xf32, #tpu.memory_space<vmem>>, vector<1x32xf32>
    %c0_117 = arith.constant 0 : index
    %c0_118 = arith.constant 0 : index
    %294 = vector.load %arg22[%c0_117, %c0_118] : memref<1x32xf32, #tpu.memory_space<vmem>>, vector<1x32xf32>
    %cst_119 = arith.constant dense<0.000000e+00> : vector<8xf32>
    %295 = vector.multi_reduction <add>, %292, %cst_119 [1] : vector<8x32xf32> to vector<8xf32>
    %296 = vector.shape_cast %295 : vector<8xf32> to vector<8x1xf32>
    %cst_120 = arith.constant 3.200000e+01 : f32
    %297 = vector.broadcast %cst_120 : f32 to vector<8x1xf32>
    %298 = arith.divf %296, %297 : vector<8x1xf32>
    %299 = vector.broadcast %298 : vector<8x1xf32> to vector<8x32xf32>
    %300 = arith.subf %292, %299 : vector<8x32xf32>
    %301 = arith.mulf %300, %300 : vector<8x32xf32>
    %cst_121 = arith.constant dense<0.000000e+00> : vector<8xf32>
    %302 = vector.multi_reduction <add>, %301, %cst_121 [1] : vector<8x32xf32> to vector<8xf32>
    %303 = vector.shape_cast %302 : vector<8xf32> to vector<8x1xf32>
    %cst_122 = arith.constant 3.200000e+01 : f32
    %304 = vector.broadcast %cst_122 : f32 to vector<8x1xf32>
    %305 = arith.divf %303, %304 : vector<8x1xf32>
    %306 = vector.broadcast %298 : vector<8x1xf32> to vector<8x32xf32>
    %307 = arith.subf %292, %306 : vector<8x32xf32>
    %cst_123 = arith.constant 9.99999974E-6 : f32
    %308 = vector.broadcast %cst_123 : f32 to vector<8x1xf32>
    %309 = arith.addf %305, %308 : vector<8x1xf32>
    %310 = math.rsqrt %309 : vector<8x1xf32>
    %311 = vector.broadcast %310 : vector<8x1xf32> to vector<8x32xf32>
    %312 = arith.mulf %307, %311 : vector<8x32xf32>
    %313 = vector.broadcast %293 : vector<1x32xf32> to vector<8x32xf32>
    %314 = arith.mulf %312, %313 : vector<8x32xf32>
    %315 = vector.broadcast %294 : vector<1x32xf32> to vector<8x32xf32>
    %316 = arith.addf %314, %315 : vector<8x32xf32>
    %c0_124 = arith.constant 0 : index
    %c0_125 = arith.constant 0 : index
    %c0_126 = arith.constant 0 : index
    %317 = vector.load %arg23[%c0_124, %c0_125, %c0_126] : memref<1x8x32xf32, #tpu.memory_space<vmem>>, vector<1x8x32xf32>
    %318 = vector.shape_cast %317 : vector<1x8x32xf32> to vector<8x32xf32>
    %319 = vector.shape_cast %316 : vector<8x32xf32> to vector<1x8x32xf32>
    tpu.vector_store %arg23[%c0_124, %c0_125, %c0_126], %319 {strides = array<i32>} : memref<1x8x32xf32, #tpu.memory_space<vmem>>, vector<1x8x32xf32>,
    return
  }
  func.func @transform_0(%arg0: i32, %arg1: i32) -> (i32, i32, i32) {
    %c0_i32 = arith.constant 0 : i32
    %c0_i32_0 = arith.constant 0 : i32
    return %arg0, %arg1, %c0_i32 : i32, i32, i32
  }
  func.func @transform_1(%arg0: i32, %arg1: i32) -> (i32, i32, i32) {
    %c0_i32 = arith.constant 0 : i32
    %c0_i32_0 = arith.constant 0 : i32
    %c0_i32_1 = arith.constant 0 : i32
    return %arg0, %c0_i32, %c0_i32_0 : i32, i32, i32
  }
  func.func @transform_2(%arg0: i32, %arg1: i32) -> (i32, i32, i32) {
    %c0_i32 = arith.constant 0 : i32
    %c0_i32_0 = arith.constant 0 : i32
    %c0_i32_1 = arith.constant 0 : i32
    return %arg0, %c0_i32, %c0_i32_0 : i32, i32, i32
  }
  func.func @transform_3(%arg0: i32, %arg1: i32) -> (i32, i32) {
    %c0_i32 = arith.constant 0 : i32
    %c0_i32_0 = arith.constant 0 : i32
    %c0_i32_1 = arith.constant 0 : i32
    return %c0_i32, %c0_i32_0 : i32, i32
  }
  func.func @transform_4(%arg0: i32, %arg1: i32) -> (i32, i32) {
    %c0_i32 = arith.constant 0 : i32
    %c0_i32_0 = arith.constant 0 : i32
    %c0_i32_1 = arith.constant 0 : i32
    return %c0_i32, %c0_i32_0 : i32, i32
  }
  func.func @transform_5(%arg0: i32, %arg1: i32) -> (i32, i32) {
    %c0_i32 = arith.constant 0 : i32
    %c0_i32_0 = arith.constant 0 : i32
    %c0_i32_1 = arith.constant 0 : i32
    return %c0_i32, %c0_i32_0 : i32, i32
  }
  func.func @transform_6(%arg0: i32, %arg1: i32) -> (i32, i32) {
    %c0_i32 = arith.constant 0 : i32
    %c0_i32_0 = arith.constant 0 : i32
    %c0_i32_1 = arith.constant 0 : i32
    return %c0_i32, %c0_i32_0 : i32, i32
  }
  func.func @transform_7(%arg0: i32, %arg1: i32) -> (i32, i32) {
    %c0_i32 = arith.constant 0 : i32
    %c0_i32_0 = arith.constant 0 : i32
    %c0_i32_1 = arith.constant 0 : i32
    return %c0_i32, %c0_i32_0 : i32, i32
  }
  func.func @transform_8(%arg0: i32, %arg1: i32) -> (i32, i32) {
    %c0_i32 = arith.constant 0 : i32
    %c0_i32_0 = arith.constant 0 : i32
    %c0_i32_1 = arith.constant 0 : i32
    return %c0_i32, %c0_i32_0 : i32, i32
  }
  func.func @transform_9(%arg0: i32, %arg1: i32) -> (i32, i32) {
    %c0_i32 = arith.constant 0 : i32
    %c0_i32_0 = arith.constant 0 : i32
    %c0_i32_1 = arith.constant 0 : i32
    return %c0_i32, %c0_i32_0 : i32, i32
  }
  func.func @transform_10(%arg0: i32, %arg1: i32) -> (i32, i32) {
    %c0_i32 = arith.constant 0 : i32
    %c0_i32_0 = arith.constant 0 : i32
    %c0_i32_1 = arith.constant 0 : i32
    return %c0_i32, %c0_i32_0 : i32, i32
  }
  func.func @transform_11(%arg0: i32, %arg1: i32) -> (i32, i32) {
    %c0_i32 = arith.constant 0 : i32
    %c0_i32_0 = arith.constant 0 : i32
    %c0_i32_1 = arith.constant 0 : i32
    return %c0_i32, %c0_i32_0 : i32, i32
  }
  func.func @transform_12(%arg0: i32, %arg1: i32) -> (i32, i32) {
    %c0_i32 = arith.constant 0 : i32
    %c0_i32_0 = arith.constant 0 : i32
    %c0_i32_1 = arith.constant 0 : i32
    return %c0_i32, %c0_i32_0 : i32, i32
  }
  func.func @transform_13(%arg0: i32, %arg1: i32) -> (i32, i32) {
    %c0_i32 = arith.constant 0 : i32
    %c0_i32_0 = arith.constant 0 : i32
    %c0_i32_1 = arith.constant 0 : i32
    return %c0_i32, %c0_i32_0 : i32, i32
  }
  func.func @transform_14(%arg0: i32, %arg1: i32) -> (i32, i32) {
    %c0_i32 = arith.constant 0 : i32
    %c0_i32_0 = arith.constant 0 : i32
    %c0_i32_1 = arith.constant 0 : i32
    return %c0_i32, %c0_i32_0 : i32, i32
  }
  func.func @transform_15(%arg0: i32, %arg1: i32) -> (i32, i32) {
    %c0_i32 = arith.constant 0 : i32
    %c0_i32_0 = arith.constant 0 : i32
    %c0_i32_1 = arith.constant 0 : i32
    return %c0_i32, %c0_i32_0 : i32, i32
  }
  func.func @transform_16(%arg0: i32, %arg1: i32) -> (i32, i32) {
    %c0_i32 = arith.constant 0 : i32
    %c0_i32_0 = arith.constant 0 : i32
    %c0_i32_1 = arith.constant 0 : i32
    return %c0_i32, %c0_i32_0 : i32, i32
  }
  func.func @transform_17(%arg0: i32, %arg1: i32) -> (i32, i32) {
    %c0_i32 = arith.constant 0 : i32
    %c0_i32_0 = arith.constant 0 : i32
    %c0_i32_1 = arith.constant 0 : i32
    return %c0_i32, %c0_i32_0 : i32, i32
  }
  func.func @transform_18(%arg0: i32, %arg1: i32) -> (i32, i32) {
    %c0_i32 = arith.constant 0 : i32
    %c0_i32_0 = arith.constant 0 : i32
    %c0_i32_1 = arith.constant 0 : i32
    return %c0_i32, %c0_i32_0 : i32, i32
  }
  func.func @transform_19(%arg0: i32, %arg1: i32) -> (i32, i32) {
    %c0_i32 = arith.constant 0 : i32
    %c0_i32_0 = arith.constant 0 : i32
    %c0_i32_1 = arith.constant 0 : i32
    return %c0_i32, %c0_i32_0 : i32, i32
  }
  func.func @transform_20(%arg0: i32, %arg1: i32) -> (i32, i32) {
    %c0_i32 = arith.constant 0 : i32
    %c0_i32_0 = arith.constant 0 : i32
    %c0_i32_1 = arith.constant 0 : i32
    return %c0_i32, %c0_i32_0 : i32, i32
  }
  func.func @transform_21(%arg0: i32, %arg1: i32) -> (i32, i32, i32) {
    %c0_i32 = arith.constant 0 : i32
    %c0_i32_0 = arith.constant 0 : i32
    return %arg0, %arg1, %c0_i32 : i32, i32, i32
  }
}

</mosaic_0001>

<bundles_post_ra>
// kernel: tpu_custom_call.1
= control target key start
LH: loop header
LB: loop body
LE: loop exit
PB: predicated region body
PF: predicated region fallthrough
CT: control target
= control target key end

     0   :  { %s5417_s0 = inlined_call_operand.hbm [shape: f32[2,8,32], index: 0, kind: input, shape index: {}]   ;;  %s5418_s1 = inlined_call_operand.hbm [shape: f32[2,8,32], index: 1, kind: input, shape index: {}]   ;;  %s5419_s2 = inlined_call_operand.hbm [shape: f32[2,8,32], index: 2, kind: input, shape index: {}]   ;;  %s5420_s3 = inlined_call_operand.hbm [shape: bf16[96,32], index: 3, kind: input, shape index: {}]   ;;  %s5421_s4 = inlined_call_operand.hbm [shape: f32[1,96], index: 4, kind: input, shape index: {}]   ;;  %s5422_s5 = inlined_call_operand.hbm [shape: bf16[32,32], index: 5, kind: input, shape index: {}]   ;;  %s5423_s6 = inlined_call_operand.hbm [shape: f32[1,32], index: 6, kind: input, shape index: {}]   ;;  %s5424_s7 = inlined_call_operand.hbm [shape: f32[1,32], index: 7, kind: input, shape index: {}]   ;;  %s5425_s8 = inlined_call_operand.hbm [shape: f32[1,32], index: 8, kind: input, shape index: {}]   ;;  %s5426_s9 = inlined_call_operand.hbm [shape: bf16[96,32], index: 9, kind: input, shape index: {}]   ;;  %s5427_s10 = inlined_call_operand.hbm [shape: f32[1,96], index: 10, kind: input, shape index: {}]   ;;  %s5428_s11 = inlined_call_operand.hbm [shape: bf16[32,32], index: 11, kind: input, shape index: {}]   ;;  %s5429_s12 = inlined_call_operand.hbm [shape: f32[1,32], index: 12, kind: input, shape index: {}]   ;;  %s5430_s13 = inlined_call_operand.hbm [shape: f32[1,32], index: 13, kind: input, shape index: {}]   ;;  %s5431_s14 = inlined_call_operand.hbm [shape: f32[1,32], index: 14, kind: input, shape index: {}]   ;;  %s5432_s15 = inlined_call_operand.hbm [shape: bf16[64,32], index: 15, kind: input, shape index: {}]   ;;  %s5433_s16 = inlined_call_operand.hbm [shape: f32[1,64], index: 16, kind: input, shape index: {}]   ;;  %s5434_s17 = inlined_call_operand.hbm [shape: bf16[32,64], index: 17, kind: input, shape index: {}]   ;;  %s5435_s18 = inlined_call_operand.hbm [shape: f32[1,32], index: 18, kind: input, shape index: {}]   ;;  %s5436_s19 = inlined_call_operand.hbm [shape: f32[1,32], index: 19, kind: input, shape index: {}]   ;;  %s5437_s20 = inlined_call_operand.hbm [shape: f32[1,32], index: 20, kind: input, shape index: {}]   ;;  %s5438_s21 = inlined_call_operand.hbm [shape: f32[2,8,32], index: 21, kind: output, shape index: {}]  }
   0x1   :  { %5482 = sst [smem:[#allocation53_spill]] %s5417_s0 }
   0x2   :  { %5483 = sst [smem:[#allocation54_spill]] %s5418_s1 }
   0x3   :  { %5484 = sst [smem:[#allocation55_spill]] %s5419_s2 }
   0x4   :  { %5485 = sst [smem:[#allocation56_spill]] %s5420_s3 }
   0x5   :  { %5486 = sst [smem:[#allocation57_spill]] %s5421_s4 }
   0x6   :  { %5487 = sst [smem:[#allocation58_spill]] %s5422_s5 }
   0x7   :  { %5488 = sst [smem:[#allocation59_spill]] %s5423_s6 }
   0x8   :  { %5489 = sst [smem:[#allocation60_spill]] %s5424_s7 }
   0x9   :  { %5490 = sst [smem:[#allocation61_spill]] %s5425_s8 }
   0xa   :  { %5491 = sst [smem:[#allocation62_spill]] %s5426_s9 }
   0xb   :  { %5492 = sst [smem:[#allocation63_spill]] %s5427_s10 }
   0xc   :  { %5493 = sst [smem:[#allocation64_spill]] %s5428_s11 }
   0xd   :  { %5494 = sst [smem:[#allocation65_spill]] %s5429_s12 }
   0xe   :  { %5495 = sst [smem:[#allocation66_spill]] %s5430_s13 }
   0xf   :  { %5496 = sst [smem:[#allocation67_spill]] %s5431_s14 }
  0x10   :  { %5497 = sst [smem:[#allocation68_spill]] %s5432_s15 }
  0x11   :  { %5498 = sst [smem:[#allocation69_spill]] %s5433_s16 }
  0x12   :  { %5499 = sst [smem:[#allocation70_spill]] %s5434_s17 }
  0x13   :  { %5500 = sst [smem:[#allocation71_spill]] %s5435_s18 }
  0x14   :  { %5501 = sst [smem:[#allocation72_spill]] %s5436_s19 }
  0x15   :  { %5502 = sst [smem:[#allocation73_spill]] %s5437_s20 }
  0x16   :  { %5503 = sst [smem:[#allocation74_spill]] %s5438_s21 }
  0x17   :  { %26 = vsyncpa [#allocation4], 0 }
  0x18   :  { %28 = vsyncpa [#allocation4 + $0x1], 0 }
  0x19   :  { %29 = vsyncpa [#allocation7], 0 }
  0x1a   :  { %31 = vsyncpa [#allocation7 + $0x1], 0 }
  0x1b   :  { %32 = vsyncpa [#allocation10], 0 }
  0x1c   :  { %33 = vsyncpa [#allocation13], 0 }
  0x1d   :  { %34 = vsyncpa [#allocation16], 0 }
  0x1e   :  { %35 = vsyncpa [#allocation19], 0 }
  0x1f   :  { %36 = vsyncpa [#allocation22], 0 }
  0x20   :  { %37 = vsyncpa [#allocation25], 0 }
  0x21   :  { %38 = vsyncpa [#allocation28], 0 }
  0x22   :  { %39 = vsyncpa [#allocation31], 0 }
  0x23   :  { %40 = vsyncpa [#allocation34], 0 }
  0x24   :  { %41 = vsyncpa [#allocation5], 0 }
  0x25   :  { %43 = vsyncpa [#allocation5 + $0x1], 0  ;;  %s4484_s2 = smov 0   ;;  %s4486_s25 = smov 0  }
  0x26   :  { %s4488_s26 = smov 0   ;;  %s4490_s27 = smov 0  }
  0x27   :  { %s4492_s3 = smov 0   ;;  %s4494_s28 = smov 0  }
  0x28 LB: > { %5504 = sst [smem:[#allocation49_spill]] %s4328_s27  ;;  %s4515_s29 = sadd.s32 4294967295, %s4336_s28   ;;  %s4336_s28 = sphi %s4494_s28, %s49_s28   ;;  %s4332_s3 = sphi %s4492_s3, %s5574_s3   ;;  %s4328_s27 = sphi %s4490_s27, %s5573_s27   ;;  %s4324_s26 = sphi %s4488_s26, %s5577_s26   ;;  %s4320_s25 = sphi %s4486_s25, %s5576_s25   ;;  %s4316_s2 = sphi %s4484_s2, %s5575_s2  }
  0x29   : > { %5505 = sst [smem:[#allocation50_spill]] %s4332_s3  ;;  %p2948_p0 = scmp.ge.s32.totalorder %s4336_s28, 1 }
  0x2a   : > { %p5455_p1 = scmp.eq.s32.totalorder %s4515_s29, 0  ;;  %p552_p2 = scmp.lt.s32.totalorder %s4336_s28, 3 }
  0x2b   : > { %s4338_s4 = smov [#allocation9]   ;;  %s4339_s22 = smov [#allocation12]  }
  0x2c   : > { %p4520_p3 = pnand %p2948_p0, %p552_p2  ;;  %s564_s30 = sshll.u32 %s4338_s4, 4  ;;  %s4524_s30 = int_to_ptr.vmem [resolvable:$true] %s564_s30 }
  0x2d   : > { %s588_s23 = sshll.u32 %s4339_s22, 4  ;;  %s4340_s1 = smov [#allocation15]   ;;  %s4535_s23 = int_to_ptr.vmem [resolvable:$true] %s588_s23 }
  0x2e   : > { %s5506_s0 = scalar_select %p4520_p3, 1, 0 }
  0x2f   : > { %p3373_p4 = pneg %p4520_p3  ;;  %s4537_s24 = sshll.u32 %s4340_s1, 4  ;;  %s614_s24 = int_to_ptr.vmem [resolvable:$true] %s4537_s24 }
  0x30   : > { %5507 = sst [smem:[#allocation51_spill]] %s5506_s0  ;;  %s5509_s27 = sld [smem:[#allocation56_spill]] }
  0x31   : > { %p4531_p6 = pnand %p3373_p4, %p5455_p1 }
  0x33   : > { %s5508_s5 = scalar_select %p4531_p6, 1, 0 }
  0x34   : > { %p4547_p8 = pneg %p4531_p6 }
  0x36   : > { %s5510_s20 = smov %s5509_s27  ;;  %s3620_s18 = scalar_lea.hbm %s5509_s27, 768 }
  0x37   : > { %p3621_p7 = scmp.ne.s32.totalorder %s5510_s20, %s3620_s18  ;;  %p3627_p11 = scmp.lt.u32.totalorder %s3620_s18, %s5510_s20 }
  0x38   : > { %s5511_s14 = scalar_select %p4547_p8, 1, 0 }
  0x39   : > { %p3623_p9 = pnand %p4547_p8, %p3621_p7 }
  0x3b   : > { %p3624_p10 = pneg %p3623_p9 }
  0x3d   : > { %p3629_p12 = pnand %p3627_p11, %p3624_p10 }
  0x3f   : > { %3632 = shalt.err (!%p3629_p12)
}
  0x40   : > { %s3633_s16 = scalar_lea.vmem %s4524_s30, 768  ;;  %p3641_p4 = scmp.lt.s32.totalorder %s4524_s30, %s4524_s30 }
  0x41   : > { %p3634_p13 = scmp.ne.s32.totalorder %s4524_s30, %s3633_s16  ;;  %p3642_p5 = scmp.lt.s32.totalorder %s3633_s16, %s3633_s16 }
  0x43   : > { %p3636_p0 = pnand %p3634_p13, %p4547_p8  ;;  %p3643_p7 = por %p3642_p5, %p3641_p4 }
  0x45   : > { %p3637_p2 = pneg %p3636_p0 }
  0x47   : > { %p3644_p9 = pnand %p3643_p7, %p3637_p2 }
  0x49   : > { %3647 = shalt.err (!%p3644_p9)
}
  0x4a   : > { %s5457_s21 = smov 64   ;;  %s4342_s18 = smov 4  }
  0x4b   : > { %3376 = dma.hbm_to_vmem [thread:$0]  (!%p4531_p6), %s5510_s20, 768, %s4524_s30, [#allocation10], %s5457_s21, %s5457_s21, %s4342_s18  }
  0x4c   : > { %s5512_s1 = sld [smem:[#allocation58_spill]] }
  0x52   : > { %s3648_s16 = scalar_lea.hbm %s5512_s1, 256 }
  0x53   : > { %p3649_p5 = scmp.ne.s32.totalorder %s5512_s1, %s3648_s16  ;;  %p3655_p12 = scmp.lt.u32.totalorder %s3648_s16, %s5512_s1 }
  0x55   : > { %p3651_p10 = pnand %p3649_p5, %p4547_p8 }
  0x57   : > { %p3652_p11 = pneg %p3651_p10 }
  0x59   : > { %p3657_p13 = pnand %p3655_p12, %p3652_p11 }
  0x5b   : > { %3660 = shalt.err (!%p3657_p13)
}
  0x5c   : > { %s3661_s30 = scalar_lea.vmem %s4535_s23, 256  ;;  %p3669_p7 = scmp.lt.s32.totalorder %s4535_s23, %s4535_s23 }
  0x5d   : > { %p3662_p0 = scmp.ne.s32.totalorder %s4535_s23, %s3661_s30  ;;  %p3670_p9 = scmp.lt.s32.totalorder %s3661_s30, %s3661_s30 }
  0x5f   : > { %p3664_p2 = pnand %p3662_p0, %p4547_p8  ;;  %p3671_p5 = por %p3670_p9, %p3669_p7 }
  0x61   : > { %p3665_p4 = pneg %p3664_p2 }
  0x63   : > { %p3672_p10 = pnand %p3671_p5, %p3665_p4 }
  0x65   : > { %3675 = shalt.err (!%p3672_p10)
}
  0x66   : > { %3382 = dma.hbm_to_vmem [thread:$0]  (!%p4531_p6), %s5512_s1, 256, %s4535_s23, [#allocation13], %s5457_s21, %s5457_s21, %s4342_s18  }
  0x67   : > { %s5513_s7 = sld [smem:[#allocation60_spill]] }
  0x6d   : > { %s3676_s27 = scalar_lea.hbm %s5513_s7, 16 }
  0x6e   : > { %p3677_p11 = scmp.ne.s32.totalorder %s5513_s7, %s3676_s27  ;;  %p3683_p0 = scmp.lt.u32.totalorder %s3676_s27, %s5513_s7 }
  0x70   : > { %p3679_p12 = pnand %p3677_p11, %p4547_p8 }
  0x72   : > { %p3680_p13 = pneg %p3679_p12 }
  0x74   : > { %p3685_p2 = pnand %p3683_p0, %p3680_p13 }
  0x76   : > { %3688 = shalt.err (!%p3685_p2)
}
  0x77   : > { %s3689_s30 = scalar_lea.vmem %s614_s24, 16  ;;  %s3696_s23 = scalar_lea.vmem %s614_s24, 32 }
  0x78   : > { %p3690_p4 = scmp.ne.s32.totalorder %s614_s24, %s3689_s30  ;;  %p3697_p5 = scmp.lt.s32.totalorder %s614_s24, %s614_s24 }
  0x79   : > { %p3698_p10 = scmp.lt.s32.totalorder %s3696_s23, %s3689_s30 }
  0x7a   : > { %p3692_p7 = pnand %p3690_p4, %p4547_p8 }
  0x7b   : > { %p3699_p1 = por %p3698_p10, %p3697_p5 }
  0x7c   : > { %p3693_p9 = pneg %p3692_p7 }
  0x7e   : > { %p3700_p3 = pnand %p3699_p1, %p3693_p9 }
  0x80   : > { %3703 = shalt.err (!%p3700_p3)
}
  0x81   : > { %3388 = dma.hbm_to_vmem [thread:$0]  (!%p4531_p6), %s5513_s7, 16, %s614_s24, [#allocation16]  }
  0x82   : > { %s4343_s10 = smov [#allocation18]   ;;  %s4344_s27 = smov [#allocation21]  }
  0x83   : > { %s634_s12 = sshll.u32 %s4343_s10, 4  ;;  %s658_s0 = sshll.u32 %s4344_s27, 4  ;;  %s635_s12 = int_to_ptr.vmem [resolvable:$true] %s634_s12  ;;  %s659_s0 = int_to_ptr.vmem [resolvable:$true] %s658_s0 }
  0x84   : > { %s5514_s9 = sld [smem:[#allocation62_spill]] }
  0x8a   : > { %s3704_s16 = scalar_lea.hbm %s5514_s9, 768 }
  0x8b   : > { %p3705_p1 = scmp.ne.s32.totalorder %s5514_s9, %s3704_s16  ;;  %p3711_p12 = scmp.lt.u32.totalorder %s3704_s16, %s5514_s9 }
  0x8d   : > { %p3707_p3 = pnand %p3705_p1, %p4547_p8 }
  0x8f   : > { %p3708_p11 = pneg %p3707_p3 }
  0x91   : > { %p3713_p13 = pnand %p3711_p12, %p3708_p11 }
  0x93   : > { %3716 = shalt.err (!%p3713_p13)
}
  0x94   : > { %s3717_s24 = scalar_lea.vmem %s635_s12, 768  ;;  %p3725_p7 = scmp.lt.s32.totalorder %s635_s12, %s635_s12 }
  0x95   : > { %p3718_p0 = scmp.ne.s32.totalorder %s635_s12, %s3717_s24  ;;  %p3726_p9 = scmp.lt.s32.totalorder %s3717_s24, %s3717_s24 }
  0x97   : > { %p3720_p2 = pnand %p3718_p0, %p4547_p8  ;;  %p3727_p5 = por %p3726_p9, %p3725_p7 }
  0x99   : > { %p3721_p4 = pneg %p3720_p2 }
  0x9b   : > { %p3728_p10 = pnand %p3727_p5, %p3721_p4 }
  0x9d   : > { %3731 = shalt.err (!%p3728_p10)
}
  0x9e   : > { %s5515_s8 = smov 64   ;;  %s5516_s11 = sld [smem:[#allocation64_spill]] }
  0x9f   : > { %3394 = dma.hbm_to_vmem [thread:$0]  (!%p4531_p6), %s5514_s9, 768, %s635_s12, [#allocation19], %s5515_s8, %s5515_s8, %s4342_s18  }
  0xa4   : > { %s3732_s22 = scalar_lea.hbm %s5516_s11, 256 }
  0xa5   : > { %p3733_p1 = scmp.ne.s32.totalorder %s5516_s11, %s3732_s22  ;;  %p3739_p12 = scmp.lt.u32.totalorder %s3732_s22, %s5516_s11 }
  0xa7   : > { %p3735_p3 = pnand %p3733_p1, %p4547_p8 }
  0xa9   : > { %p3736_p11 = pneg %p3735_p3 }
  0xab   : > { %p3741_p13 = pnand %p3739_p12, %p3736_p11 }
  0xad   : > { %3744 = shalt.err (!%p3741_p13)
}
  0xae   : > { %s3745_s24 = scalar_lea.vmem %s659_s0, 256  ;;  %p3753_p7 = scmp.lt.s32.totalorder %s659_s0, %s659_s0 }
  0xaf   : > { %p3746_p0 = scmp.ne.s32.totalorder %s659_s0, %s3745_s24  ;;  %p3754_p9 = scmp.lt.s32.totalorder %s3745_s24, %s3745_s24 }
  0xb1   : > { %p3748_p2 = pnand %p3746_p0, %p4547_p8  ;;  %p3755_p5 = por %p3754_p9, %p3753_p7 }
  0xb3   : > { %p3749_p4 = pneg %p3748_p2 }
  0xb5   : > { %p3756_p10 = pnand %p3755_p5, %p3749_p4 }
  0xb7   : > { %3759 = shalt.err (!%p3756_p10)
}
  0xb8   : > { %3400 = dma.hbm_to_vmem [thread:$0]  (!%p4531_p6), %s5516_s11, 256, %s659_s0, [#allocation22], %s5515_s8, %s5515_s8, %s4342_s18  }
  0xb9   : > { %s4345_s10 = smov [#allocation24]   ;;  %s4346_s4 = smov [#allocation27]  }
  0xba   : > { %s683_s27 = sshll.u32 %s4345_s10, 4  ;;  %s704_s22 = sshll.u32 %s4346_s4, 4  ;;  %s684_s27 = int_to_ptr.vmem [resolvable:$true] %s683_s27  ;;  %s705_s22 = int_to_ptr.vmem [resolvable:$true] %s704_s22 }
  0xbb   : > { %s5517_s13 = sld [smem:[#allocation66_spill]] }
  0xc1   : > { %s3760_s23 = scalar_lea.hbm %s5517_s13, 16 }
  0xc2   : > { %p3761_p1 = scmp.ne.s32.totalorder %s5517_s13, %s3760_s23  ;;  %p3767_p12 = scmp.lt.u32.totalorder %s3760_s23, %s5517_s13 }
  0xc4   : > { %p3763_p3 = pnand %p3761_p1, %p4547_p8 }
  0xc6   : > { %p3764_p11 = pneg %p3763_p3 }
  0xc8   : > { %p3769_p13 = pnand %p3767_p12, %p3764_p11 }
  0xca   : > { %3772 = shalt.err (!%p3769_p13)
}
  0xcb   : > { %s3773_s0 = scalar_lea.vmem %s684_s27, 16  ;;  %s3780_s21 = scalar_lea.vmem %s684_s27, 32 }
  0xcc   : > { %p3774_p0 = scmp.ne.s32.totalorder %s684_s27, %s3773_s0  ;;  %p3781_p7 = scmp.lt.s32.totalorder %s684_s27, %s684_s27 }
  0xcd   : > { %p3782_p9 = scmp.lt.s32.totalorder %s3780_s21, %s3773_s0 }
  0xce   : > { %p3776_p2 = pnand %p3774_p0, %p4547_p8 }
  0xcf   : > { %p3783_p5 = por %p3782_p9, %p3781_p7 }
  0xd0   : > { %p3777_p4 = pneg %p3776_p2 }
  0xd2   : > { %p3784_p10 = pnand %p3783_p5, %p3777_p4 }
  0xd4   : > { %3787 = shalt.err (!%p3784_p10)
}
  0xd5   : > { %3406 = dma.hbm_to_vmem [thread:$0]  (!%p4531_p6), %s5517_s13, 16, %s684_s27, [#allocation25]  }
  0xd6   : > { %s5518_s15 = sld [smem:[#allocation68_spill]] }
  0xdc   : > { %s3788_s30 = scalar_lea.hbm %s5518_s15, 512 }
  0xdd   : > { %p3789_p1 = scmp.ne.s32.totalorder %s5518_s15, %s3788_s30  ;;  %p3795_p12 = scmp.lt.u32.totalorder %s3788_s30, %s5518_s15 }
  0xdf   : > { %p3791_p3 = pnand %p3789_p1, %p4547_p8 }
  0xe1   : > { %p3792_p11 = pneg %p3791_p3 }
  0xe3   : > { %p3797_p13 = pnand %p3795_p12, %p3792_p11 }
  0xe5   : > { %3800 = shalt.err (!%p3797_p13)
}
  0xe6   : > { %s3801_s0 = scalar_lea.vmem %s705_s22, 512  ;;  %p3809_p7 = scmp.lt.s32.totalorder %s705_s22, %s705_s22 }
  0xe7   : > { %p3802_p0 = scmp.ne.s32.totalorder %s705_s22, %s3801_s0  ;;  %p3810_p9 = scmp.lt.s32.totalorder %s3801_s0, %s3801_s0 }
  0xe9   : > { %p3804_p2 = pnand %p3802_p0, %p4547_p8  ;;  %p3811_p5 = por %p3810_p9, %p3809_p7 }
  0xeb   : > { %p3805_p4 = pneg %p3804_p2 }
  0xed   : > { %p3812_p10 = pnand %p3811_p5, %p3805_p4 }
  0xef   : > { %3815 = shalt.err (!%p3812_p10)
}
  0xf0   : > { %3412 = dma.hbm_to_vmem [thread:$0]  (!%p4531_p6), %s5518_s15, 512, %s705_s22, [#allocation28], %s5515_s8, %s5515_s8, %s4342_s18  }
  0xf1   : > { %s4347_s10 = smov [#allocation30]   ;;  %s4348_s1 = smov [#allocation33]  }
  0xf2   : > { %s728_s4 = sshll.u32 %s4347_s10, 4  ;;  %s753_s16 = sshll.u32 %s4348_s1, 4  ;;  %s729_s4 = int_to_ptr.vmem [resolvable:$true] %s728_s4  ;;  %s754_s16 = int_to_ptr.vmem [resolvable:$true] %s753_s16 }
  0xf3   : > { %s5519_s17 = sld [smem:[#allocation70_spill]] }
  0xf9   : > { %s3816_s6 = scalar_lea.hbm %s5519_s17, 256 }
  0xfa   : > { %p3817_p1 = scmp.ne.s32.totalorder %s5519_s17, %s3816_s6  ;;  %p3823_p12 = scmp.lt.u32.totalorder %s3816_s6, %s5519_s17 }
  0xfc   : > { %p3819_p3 = pnand %p3817_p1, %p4547_p8 }
  0xfe   : > { %p3820_p11 = pneg %p3819_p3 }
 0x100   : > { %p3825_p13 = pnand %p3823_p12, %p3820_p11 }
 0x102   : > { %3828 = shalt.err (!%p3825_p13)
}
 0x103   : > { %s3829_s22 = scalar_lea.vmem %s729_s4, 256  ;;  %p3837_p7 = scmp.lt.s32.totalorder %s729_s4, %s729_s4 }
 0x104   : > { %p3830_p0 = scmp.ne.s32.totalorder %s729_s4, %s3829_s22  ;;  %p3838_p9 = scmp.lt.s32.totalorder %s3829_s22, %s3829_s22 }
 0x106   : > { %p3832_p2 = pnand %p3830_p0, %p4547_p8  ;;  %p3839_p5 = por %p3838_p9, %p3837_p7 }
 0x108   : > { %p3833_p4 = pneg %p3832_p2 }
 0x10a   : > { %p3840_p10 = pnand %p3839_p5, %p3833_p4 }
 0x10c   : > { %3843 = shalt.err (!%p3840_p10)
}
 0x10d   : > { %3418 = dma.hbm_to_vmem [thread:$0]  (!%p4531_p6), %s5519_s17, 256, %s729_s4, [#allocation31], %s5515_s8, %s5515_s8, %s4342_s18  }
 0x10e   : > { %s5520_s19 = sld [smem:[#allocation72_spill]] }
 0x114   : > { %s3844_s23 = scalar_lea.hbm %s5520_s19, 16 }
 0x115   : > { %p3845_p1 = scmp.ne.s32.totalorder %s5520_s19, %s3844_s23  ;;  %p3851_p12 = scmp.lt.u32.totalorder %s3844_s23, %s5520_s19 }
 0x117   : > { %p3847_p3 = pnand %p3845_p1, %p4547_p8 }
 0x119   : > { %p3848_p11 = pneg %p3847_p3 }
 0x11b   : > { %p3853_p13 = pnand %p3851_p12, %p3848_p11 }
 0x11d   : > { %3856 = shalt.err (!%p3853_p13)
}
 0x11e   : > { %s3857_s27 = scalar_lea.vmem %s754_s16, 16  ;;  %s3864_s18 = scalar_lea.vmem %s754_s16, 32 }
 0x11f   : > { %p3858_p0 = scmp.ne.s32.totalorder %s754_s16, %s3857_s27  ;;  %p3865_p7 = scmp.lt.s32.totalorder %s754_s16, %s754_s16 }
 0x120   : > { %p3866_p9 = scmp.lt.s32.totalorder %s3864_s18, %s3857_s27 }
 0x121   : > { %p3860_p2 = pnand %p3858_p0, %p4547_p8 }
 0x122   : > { %p3867_p5 = por %p3866_p9, %p3865_p7 }
 0x123   : > { %p3861_p4 = pneg %p3860_p2 }
 0x125   : > { %p3868_p10 = pnand %p3867_p5, %p3861_p4 }
 0x127   : > { %3871 = shalt.err (!%p3868_p10)
}
 0x128   : > { %3424 = dma.hbm_to_vmem [thread:$0]  (!%p4531_p6), %s5520_s19, 16, %s754_s16, [#allocation34]  }
 0x129   : > { %s2947_s22 = sadd.s32 4294967294, %s4336_s28   ;;  %s61_s21 = sadd.s32 1, %s4332_s3 }
 0x12a   : > { %s70_s10 = sadd.s32 1, %s4324_s26  ;;  %p63_p1 = scmp.ge.s32.totalorder %s61_s21, 2 }
 0x12b   : > { %p77_p3 = scmp.ne.s32.totalorder %s4324_s26, %s4320_s25  ;;  %p78_p11 = scmp.eq.s32.totalorder %s4336_s28, 0 }
 0x12c   : > { %p83_p12 = scmp.ne.s32.totalorder %s4320_s25, %s4316_s2  ;;  %s5579_s21 = smov (%p63_p1, %s61_s21), 0 }
 0x12d   : > { %5521 = sst [smem:[#allocation52_spill]] %s5579_s21  ;;  %p4746_p13 = por %p78_p11, %p77_p3 }
 0x12e   : > { %p5523_p0 = scmp.eq.s32.totalorder %s4515_s29, 0  ;;  %s65_s30 = ssub.s32 %s4332_s3, %s5579_s21 }
 0x12f   : > { %p539_p4 = scmp.eq.s32.totalorder %s4515_s29, 1  ;;  %p68_p7 = scmp.eq.s32.totalorder %s65_s30, 0 }
 0x130   : > { %p4752_p2 = por %p5523_p0, %p83_p12  ;;  %p545_p9 = scmp.eq.s32.totalorder %s2947_s22, 1 }
 0x131   : > { %p4759_p5 = por %p539_p4, %p77_p3  ;;  %p3460_p10 = scmp.lt.s32.totalorder %s4336_s28, 2 }
 0x132   : > { %s5524_s16 = scalar_select %p4752_p2, 1, 0 }
 0x133   : > { %s5525_s23 = scalar_select %p4759_p5, 1, 0 }
 0x134   : > { %s4765_s6 = scalar_select %p68_p7, %s4324_s26, %s70_s10  }
 0x135   : > { %p4767_p1 = por %p545_p9, %p83_p12  ;;  %s5460_s12 = sand.u32 1, %s4324_s26  }
 0x136   : > { %s4774_s0 = sshll.u32 %s5460_s12, 3  ;;  %s4777_s27 = sshll.u32 %s4332_s3, 7 }
 0x137   : > { %s5526_s24 = scalar_select %p4767_p1, 1, 0 }
 0x138   : > { %p4781_p3 = pnand %p3460_p10, %p4746_p13  ;;  %s794_s8 = sand.u32 1, %s4336_s28  }
 0x139   : > { %s5528_s10 = sld [smem:[#allocation54_spill]]  ;;  %s798_s12 = scalar_lea.vmem [#allocation6], %s4774_s0 }
 0x13a   : > { %s5527_s18 = scalar_select %p4781_p3, 1, 0 }
 0x13b   : > { %s805_s7 = sshll.u32 %s798_s12, 4  ;;  %s4349_s1 = smov [#allocation11]   ;;  %s4793_s7 = int_to_ptr.vmem [resolvable:$true] %s805_s7 }
 0x13c   : > { %s4795_s9 = sshll.u32 %s4349_s1, 4  ;;  %s4797_s11 = scalar_lea.sflag [#allocation7], %s794_s8  ;;  %s579_s9 = int_to_ptr.vmem [resolvable:$true] %s4795_s9 }
 0x13d   : > { %p4803_p12 = pneg %p4781_p3 }
 0x13f   : > { %s4790_s30 = scalar_lea.hbm %s5528_s10, %s4777_s27  ;;  %s3877_s15 = scalar_lea.hbm %s5528_s10, 256 }
 0x140   : > { %s3872_s13 = scalar_lea.hbm %s4790_s30, 128  ;;  %p3878_p4 = scmp.lt.u32.totalorder %s4790_s30, %s5528_s10 }
 0x141   : > { %p3873_p11 = scmp.ne.s32.totalorder %s4790_s30, %s3872_s13  ;;  %p3879_p7 = scmp.lt.u32.totalorder %s3877_s15, %s3872_s13 }
 0x142   : > { %s5529_s4 = scalar_select %p4803_p12, 1, 0 }
 0x143   : > { %p3875_p13 = pnand %p4803_p12, %p3873_p11  ;;  %p3880_p9 = por %p3879_p7, %p3878_p4 }
 0x144   : > { %p3881_p10 = scmp.lt.u32.totalorder %s3872_s13, %s4790_s30 }
 0x145   : > { %p3876_p0 = pneg %p3875_p13 }
 0x146   : > { %p3882_p1 = por %p3881_p10, %p3880_p9 }
 0x148   : > { %p3883_p5 = pnand %p3882_p1, %p3876_p0 }
 0x14a   : > { %3886 = shalt.err (!%p3883_p5)
}
 0x14b   : > { %s3887_s8 = scalar_lea.vmem %s4793_s7, 128  ;;  %s4350_s22 = smov [#allocation6]  }
 0x14c   : > { %p3888_p11 = scmp.ne.s32.totalorder %s4793_s7, %s3887_s8  ;;  %s3892_s12 = sshll.u32 %s4350_s22, 4  ;;  %s3893_s12 = int_to_ptr.vmem [resolvable:$false] %s3892_s12 }
 0x14d   : > { %s3894_s17 = scalar_lea.vmem %s3893_s12, 256  ;;  %p3895_p6 = scmp.lt.s32.totalorder %s4793_s7, %s3893_s12 }
 0x14e   : > { %p3890_p13 = pnand %p3888_p11, %p4803_p12  ;;  %p3896_p8 = scmp.lt.s32.totalorder %s3894_s17, %s3887_s8 }
 0x150   : > { %p3891_p2 = pneg %p3890_p13  ;;  %p3897_p4 = por %p3896_p8, %p3895_p6 }
 0x152   : > { %p3898_p7 = pnand %p3897_p4, %p3891_p2 }
 0x154   : > { %3901 = shalt.err (!%p3898_p7)
}
 0x155   : > { %3434 = dma.hbm_to_vmem [thread:$0]  (!%p4781_p3), %s4790_s30, 128, %s4793_s7, %s4797_s11  }
 0x156   : > { %s5530_s1 = sld [smem:[#allocation57_spill]]  ;;  %p5531_p6 = scmp.ne.s32.totalorder %s5511_s14, 0 }
 0x15c   : > { %s3902_s22 = scalar_lea.hbm %s5530_s1, 16 }
 0x15d   : > { %p3903_p5 = scmp.ne.s32.totalorder %s5530_s1, %s3902_s22  ;;  %p3909_p1 = scmp.lt.u32.totalorder %s3902_s22, %s5530_s1 }
 0x15f   : > { %p3905_p8 = pnand %p3903_p5, %p5531_p6 }
 0x161   : > { %p3906_p2 = pneg %p3905_p8 }
 0x163   : > { %p3911_p0 = pnand %p3909_p1, %p3906_p2 }
 0x165   : > { %3914 = shalt.err (!%p3911_p0)
}
 0x166   : > { %s3915_s17 = scalar_lea.vmem %s579_s9, 16  ;;  %s3922_s7 = scalar_lea.vmem %s579_s9, 32 }
 0x167   : > { %p3916_p9 = scmp.ne.s32.totalorder %s579_s9, %s3915_s17  ;;  %p3923_p13 = scmp.lt.s32.totalorder %s579_s9, %s579_s9 }
 0x168   : > { %p3924_p4 = scmp.lt.s32.totalorder %s3922_s7, %s3915_s17 }
 0x169   : > { %p3918_p10 = pnand %p3916_p9, %p5531_p6 }
 0x16a   : > { %p3925_p7 = por %p3924_p4, %p3923_p13 }
 0x16b   : > { %p3919_p11 = pneg %p3918_p10 }
 0x16d   : > { %p3926_p3 = pnand %p3925_p7, %p3919_p11 }
 0x16f   : > { %3929 = shalt.err (!%p3926_p3)
}
 0x170   : > { %p5532_p5 = scmp.ne.s32.totalorder %s5508_s5, 0  ;;  %s4351_s30 = smov [#allocation14]  }
 0x171   : > { %s602_s13 = sshll.u32 %s4351_s30, 4  ;;  %s4352_s15 = smov [#allocation17]   ;;  %s603_s13 = int_to_ptr.vmem [resolvable:$true] %s602_s13 }
 0x172   : > { %3379 = dma.hbm_to_vmem [thread:$0]  (!%p5532_p5), %s5530_s1, 16, %s579_s9, [#allocation10]  }
 0x173   : > { %s624_s22 = sshll.u32 %s4352_s15, 4  ;;  %s5533_s20 = sld [smem:[#allocation59_spill]]  ;;  %s625_s22 = int_to_ptr.vmem [resolvable:$true] %s624_s22 }
 0x179   : > { %s3930_s21 = scalar_lea.hbm %s5533_s20, 16 }
 0x17a   : > { %p3931_p3 = scmp.ne.s32.totalorder %s5533_s20, %s3930_s21  ;;  %p3937_p1 = scmp.lt.u32.totalorder %s3930_s21, %s5533_s20 }
 0x17c   : > { %p3933_p8 = pnand %p3931_p3, %p5531_p6 }
 0x17e   : > { %p3934_p2 = pneg %p3933_p8 }
 0x180   : > { %p3939_p0 = pnand %p3937_p1, %p3934_p2 }
 0x182   : > { %3942 = shalt.err (!%p3939_p0)
}
 0x183   : > { %s3943_s9 = scalar_lea.vmem %s603_s13, 16  ;;  %s3950_s10 = scalar_lea.vmem %s603_s13, 32 }
 0x184   : > { %p3944_p9 = scmp.ne.s32.totalorder %s603_s13, %s3943_s9  ;;  %p3951_p13 = scmp.lt.s32.totalorder %s603_s13, %s603_s13 }
 0x185   : > { %p3952_p4 = scmp.lt.s32.totalorder %s3950_s10, %s3943_s9 }
 0x186   : > { %p3946_p10 = pnand %p3944_p9, %p5531_p6 }
 0x187   : > { %p3953_p7 = por %p3952_p4, %p3951_p13 }
 0x188   : > { %p3947_p11 = pneg %p3946_p10 }
 0x18a   : > { %p3954_p12 = pnand %p3953_p7, %p3947_p11 }
 0x18c   : > { %3957 = shalt.err (!%p3954_p12)
}
 0x18d   : > { %3385 = dma.hbm_to_vmem [thread:$0]  (!%p5532_p5), %s5533_s20, 16, %s603_s13, [#allocation13]  }
 0x18e   : > { %s5534_s8 = sld [smem:[#allocation61_spill]] }
 0x194   : > { %s3958_s12 = scalar_lea.hbm %s5534_s8, 16 }
 0x195   : > { %p3959_p3 = scmp.ne.s32.totalorder %s5534_s8, %s3958_s12  ;;  %p3965_p12 = scmp.lt.u32.totalorder %s3958_s12, %s5534_s8 }
 0x197   : > { %p3961_p8 = pnand %p3959_p3, %p5531_p6 }
 0x199   : > { %p3962_p2 = pneg %p3961_p8 }
 0x19b   : > { %p3967_p1 = pnand %p3965_p12, %p3962_p2 }
 0x19d   : > { %3970 = shalt.err (!%p3967_p1)
}
 0x19e   : > { %s3971_s10 = scalar_lea.vmem %s625_s22, 16  ;;  %s3978_s13 = scalar_lea.vmem %s625_s22, 32 }
 0x19f   : > { %p3972_p0 = scmp.ne.s32.totalorder %s625_s22, %s3971_s10  ;;  %p3979_p11 = scmp.lt.s32.totalorder %s625_s22, %s625_s22 }
 0x1a0   : > { %p3980_p13 = scmp.lt.s32.totalorder %s3978_s13, %s3971_s10 }
 0x1a1   : > { %p3974_p9 = pnand %p3972_p0, %p5531_p6 }
 0x1a2   : > { %p3981_p4 = por %p3980_p13, %p3979_p11 }
 0x1a3   : > { %p3975_p10 = pneg %p3974_p9 }
 0x1a5   : > { %p3982_p7 = pnand %p3981_p4, %p3975_p10 }
 0x1a7   : > { %3985 = shalt.err (!%p3982_p7)
}
 0x1a8   : > { %3391 = dma.hbm_to_vmem [thread:$0]  (!%p5532_p5), %s5534_s8, 16, %s625_s22, [#allocation16]  }
 0x1a9   : > { %s4353_s3 = smov [#allocation20]   ;;  %s4354_s12 = smov [#allocation23]  }
 0x1aa   : > { %s648_s21 = sshll.u32 %s4353_s3, 4  ;;  %s672_s17 = sshll.u32 %s4354_s12, 4  ;;  %s649_s21 = int_to_ptr.vmem [resolvable:$true] %s648_s21  ;;  %s673_s17 = int_to_ptr.vmem [resolvable:$true] %s672_s17 }
 0x1ab   : > { %s5535_s9 = sld [smem:[#allocation63_spill]] }
 0x1b1   : > { %s3986_s1 = scalar_lea.hbm %s5535_s9, 16 }
 0x1b2   : > { %p3987_p3 = scmp.ne.s32.totalorder %s5535_s9, %s3986_s1  ;;  %p3993_p12 = scmp.lt.u32.totalorder %s3986_s1, %s5535_s9 }
 0x1b4   : > { %p3989_p8 = pnand %p3987_p3, %p5531_p6 }
 0x1b6   : > { %p3990_p2 = pneg %p3989_p8 }
 0x1b8   : > { %p3995_p1 = pnand %p3993_p12, %p3990_p2 }
 0x1ba   : > { %3998 = shalt.err (!%p3995_p1)
}
 0x1bb   : > { %s3999_s22 = scalar_lea.vmem %s649_s21, 16  ;;  %s4006_s15 = scalar_lea.vmem %s649_s21, 32 }
 0x1bc   : > { %p4000_p0 = scmp.ne.s32.totalorder %s649_s21, %s3999_s22  ;;  %p4007_p11 = scmp.lt.s32.totalorder %s649_s21, %s649_s21 }
 0x1bd   : > { %p4008_p13 = scmp.lt.s32.totalorder %s4006_s15, %s3999_s22 }
 0x1be   : > { %p4002_p9 = pnand %p4000_p0, %p5531_p6 }
 0x1bf   : > { %p4009_p4 = por %p4008_p13, %p4007_p11 }
 0x1c0   : > { %p4003_p10 = pneg %p4002_p9 }
 0x1c2   : > { %p4010_p7 = pnand %p4009_p4, %p4003_p10 }
 0x1c4   : > { %4013 = shalt.err (!%p4010_p7)
}
 0x1c5   : > { %3397 = dma.hbm_to_vmem [thread:$0]  (!%p5532_p5), %s5535_s9, 16, %s649_s21, [#allocation19]  }
 0x1c6   : > { %s5536_s7 = sld [smem:[#allocation65_spill]] }
 0x1cc   : > { %s4014_s19 = scalar_lea.hbm %s5536_s7, 16 }
 0x1cd   : > { %p4015_p3 = scmp.ne.s32.totalorder %s5536_s7, %s4014_s19  ;;  %p4021_p12 = scmp.lt.u32.totalorder %s4014_s19, %s5536_s7 }
 0x1cf   : > { %p4017_p8 = pnand %p4015_p3, %p5531_p6 }
 0x1d1   : > { %p4018_p2 = pneg %p4017_p8 }
 0x1d3   : > { %p4023_p1 = pnand %p4021_p12, %p4018_p2 }
 0x1d5   : > { %4026 = shalt.err (!%p4023_p1)
}
 0x1d6   : > { %s4027_s15 = scalar_lea.vmem %s673_s17, 16  ;;  %s4034_s21 = scalar_lea.vmem %s673_s17, 32 }
 0x1d7   : > { %p4028_p0 = scmp.ne.s32.totalorder %s673_s17, %s4027_s15  ;;  %p4035_p11 = scmp.lt.s32.totalorder %s673_s17, %s673_s17 }
 0x1d8   : > { %p4036_p13 = scmp.lt.s32.totalorder %s4034_s21, %s4027_s15 }
 0x1d9   : > { %p4030_p9 = pnand %p4028_p0, %p5531_p6 }
 0x1da   : > { %p4037_p4 = por %p4036_p13, %p4035_p11 }
 0x1db   : > { %p4031_p10 = pneg %p4030_p9 }
 0x1dd   : > { %p4038_p7 = pnand %p4037_p4, %p4031_p10 }
 0x1df   : > { %4041 = shalt.err (!%p4038_p7)
}
 0x1e0   : > { %3403 = dma.hbm_to_vmem [thread:$0]  (!%p5532_p5), %s5536_s7, 16, %s673_s17, [#allocation22]  }
 0x1e1   : > { %s4355_s20 = smov [#allocation26]   ;;  %s4356_s19 = smov [#allocation29]  }
 0x1e2   : > { %s694_s1 = sshll.u32 %s4355_s20, 4  ;;  %s718_s10 = sshll.u32 %s4356_s19, 4  ;;  %s695_s1 = int_to_ptr.vmem [resolvable:$true] %s694_s1  ;;  %s719_s10 = int_to_ptr.vmem [resolvable:$true] %s718_s10 }
 0x1e3   : > { %s5537_s22 = sld [smem:[#allocation67_spill]] }
 0x1e9   : > { %s4042_s8 = scalar_lea.hbm %s5537_s22, 16 }
 0x1ea   : > { %p4043_p3 = scmp.ne.s32.totalorder %s5537_s22, %s4042_s8  ;;  %p4049_p12 = scmp.lt.u32.totalorder %s4042_s8, %s5537_s22 }
 0x1ec   : > { %p4045_p8 = pnand %p4043_p3, %p5531_p6 }
 0x1ee   : > { %p4046_p2 = pneg %p4045_p8 }
 0x1f0   : > { %p4051_p1 = pnand %p4049_p12, %p4046_p2 }
 0x1f2   : > { %4054 = shalt.err (!%p4051_p1)
}
 0x1f3   : > { %s4055_s17 = scalar_lea.vmem %s695_s1, 16  ;;  %s4062_s12 = scalar_lea.vmem %s695_s1, 32 }
 0x1f4   : > { %p4056_p0 = scmp.ne.s32.totalorder %s695_s1, %s4055_s17  ;;  %p4063_p11 = scmp.lt.s32.totalorder %s695_s1, %s695_s1 }
 0x1f5   : > { %p4064_p13 = scmp.lt.s32.totalorder %s4062_s12, %s4055_s17 }
 0x1f6   : > { %p4058_p9 = pnand %p4056_p0, %p5531_p6 }
 0x1f7   : > { %p4065_p4 = por %p4064_p13, %p4063_p11 }
 0x1f8   : > { %p4059_p10 = pneg %p4058_p9 }
 0x1fa   : > { %p4066_p7 = pnand %p4065_p4, %p4059_p10 }
 0x1fc   : > { %4069 = shalt.err (!%p4066_p7)
}
 0x1fd   : > { %3409 = dma.hbm_to_vmem [thread:$0]  (!%p5532_p5), %s5537_s22, 16, %s695_s1, [#allocation25]  }
 0x1fe   : > { %s5538_s13 = sld [smem:[#allocation69_spill]] }
 0x204   : > { %s4070_s30 = scalar_lea.hbm %s5538_s13, 16 }
 0x205   : > { %p4071_p3 = scmp.ne.s32.totalorder %s5538_s13, %s4070_s30  ;;  %p4077_p12 = scmp.lt.u32.totalorder %s4070_s30, %s5538_s13 }
 0x207   : > { %p4073_p8 = pnand %p4071_p3, %p5531_p6 }
 0x209   : > { %p4074_p2 = pneg %p4073_p8 }
 0x20b   : > { %p4079_p1 = pnand %p4077_p12, %p4074_p2 }
 0x20d   : > { %4082 = shalt.err (!%p4079_p1)
}
 0x20e   : > { %s4083_s12 = scalar_lea.vmem %s719_s10, 16  ;;  %s4090_s1 = scalar_lea.vmem %s719_s10, 32 }
 0x20f   : > { %p4084_p0 = scmp.ne.s32.totalorder %s719_s10, %s4083_s12  ;;  %p4091_p11 = scmp.lt.s32.totalorder %s719_s10, %s719_s10 }
 0x210   : > { %p4092_p13 = scmp.lt.s32.totalorder %s4090_s1, %s4083_s12 }
 0x211   : > { %p4086_p9 = pnand %p4084_p0, %p5531_p6 }
 0x212   : > { %p4093_p4 = por %p4092_p13, %p4091_p11 }
 0x213   : > { %p4087_p10 = pneg %p4086_p9 }
 0x215   : > { %p4094_p7 = pnand %p4093_p4, %p4087_p10 }
 0x217   : > { %4097 = shalt.err (!%p4094_p7)
}
 0x218   : > { %3415 = dma.hbm_to_vmem [thread:$0]  (!%p5532_p5), %s5538_s13, 16, %s719_s10, [#allocation28]  }
 0x219   : > { %s4357_s8 = smov [#allocation32]   ;;  %s4358_s30 = smov [#allocation35]  }
 0x21a   : > { %s742_s9 = sshll.u32 %s4357_s8, 4  ;;  %s764_s15 = sshll.u32 %s4358_s30, 4  ;;  %s743_s9 = int_to_ptr.vmem [resolvable:$true] %s742_s9  ;;  %s765_s15 = int_to_ptr.vmem [resolvable:$true] %s764_s15 }
 0x21b   : > { %s5539_s17 = sld [smem:[#allocation71_spill]] }
 0x221   : > { %s4098_s7 = scalar_lea.hbm %s5539_s17, 16 }
 0x222   : > { %p4099_p3 = scmp.ne.s32.totalorder %s5539_s17, %s4098_s7  ;;  %p4105_p12 = scmp.lt.u32.totalorder %s4098_s7, %s5539_s17 }
 0x224   : > { %p4101_p8 = pnand %p4099_p3, %p5531_p6 }
 0x226   : > { %p4102_p2 = pneg %p4101_p8 }
 0x228   : > { %p4107_p1 = pnand %p4105_p12, %p4102_p2 }
 0x22a   : > { %4110 = shalt.err (!%p4107_p1)
}
 0x22b   : > { %s4111_s10 = scalar_lea.vmem %s743_s9, 16  ;;  %s4118_s19 = scalar_lea.vmem %s743_s9, 32 }
 0x22c   : > { %p4112_p0 = scmp.ne.s32.totalorder %s743_s9, %s4111_s10  ;;  %p4119_p11 = scmp.lt.s32.totalorder %s743_s9, %s743_s9 }
 0x22d   : > { %p4120_p13 = scmp.lt.s32.totalorder %s4118_s19, %s4111_s10 }
 0x22e   : > { %p4114_p9 = pnand %p4112_p0, %p5531_p6 }
 0x22f   : > { %p4121_p4 = por %p4120_p13, %p4119_p11 }
 0x230   : > { %p4115_p10 = pneg %p4114_p9 }
 0x232   : > { %p4122_p7 = pnand %p4121_p4, %p4115_p10 }
 0x234   : > { %4125 = shalt.err (!%p4122_p7)
}
 0x235   : > { %3421 = dma.hbm_to_vmem [thread:$0]  (!%p5532_p5), %s5539_s17, 16, %s743_s9, [#allocation31]  }
 0x236   : > { %s5540_s21 = sld [smem:[#allocation73_spill]] }
 0x23c   : > { %s4126_s3 = scalar_lea.hbm %s5540_s21, 16 }
 0x23d   : > { %p4127_p3 = scmp.ne.s32.totalorder %s5540_s21, %s4126_s3  ;;  %p4133_p12 = scmp.lt.u32.totalorder %s4126_s3, %s5540_s21 }
 0x23f   : > { %p4129_p8 = pnand %p4127_p3, %p5531_p6 }
 0x241   : > { %p4130_p2 = pneg %p4129_p8 }
 0x243   : > { %p4135_p1 = pnand %p4133_p12, %p4130_p2 }
 0x245   : > { %4138 = shalt.err (!%p4135_p1)
}
 0x246   : > { %s4139_s19 = scalar_lea.vmem %s765_s15, 16  ;;  %s4146_s9 = scalar_lea.vmem %s765_s15, 32 }
 0x247   : > { %p4140_p0 = scmp.ne.s32.totalorder %s765_s15, %s4139_s19  ;;  %p4147_p11 = scmp.lt.s32.totalorder %s765_s15, %s765_s15 }
 0x248   : > { %p4148_p13 = scmp.lt.s32.totalorder %s4146_s9, %s4139_s19 }
 0x249   : > { %p4142_p9 = pnand %p4140_p0, %p5531_p6 }
 0x24a   : > { %p4149_p4 = por %p4148_p13, %p4147_p11 }
 0x24b   : > { %p4143_p10 = pneg %p4142_p9 }
 0x24d   : > { %p4150_p7 = pnand %p4149_p4, %p4143_p10 }
 0x24f   : > { %4153 = shalt.err (!%p4150_p7)
}
 0x250   : > { %3427 = dma.hbm_to_vmem [thread:$0]  (!%p5532_p5), %s5540_s21, 16, %s765_s15, [#allocation34]  }
 0x251   : > { %s5541_s22 = sld [smem:[#allocation53_spill]]  ;;  %s779_s12 = scalar_lea.vmem [#allocation3], %s4774_s0 }
 0x252   : > { %s787_s5 = sshll.u32 %s779_s12, 4  ;;  %s5542_s10 = sld [smem:[#allocation55_spill]]  ;;  %s4997_s5 = int_to_ptr.vmem [resolvable:$true] %s787_s5 }
 0x253   : > { %s5543_s9 = sand.u32 1, %s4324_s26   ;;  %p5544_p5 = scmp.ne.s32.totalorder %s5529_s4, 0 }
 0x254   : > { %s776_s15 = scalar_lea.sflag [#allocation4], %s5543_s9 }
 0x257   : > { %s4994_s3 = scalar_lea.hbm %s5541_s22, %s4777_s27  ;;  %s4159_s7 = scalar_lea.hbm %s5541_s22, 256 }
 0x258   : > { %s5003_s19 = scalar_lea.hbm %s5542_s10, %s4777_s27  ;;  %s4154_s8 = scalar_lea.hbm %s4994_s3, 128 }
 0x259   : > { %p4155_p6 = scmp.ne.s32.totalorder %s4994_s3, %s4154_s8  ;;  %p4160_p2 = scmp.lt.u32.totalorder %s4994_s3, %s5541_s22 }
 0x25a   : > { %p4161_p12 = scmp.lt.u32.totalorder %s4159_s7, %s4154_s8  ;;  %p4163_p0 = scmp.lt.u32.totalorder %s4154_s8, %s4994_s3 }
 0x25b   : > { %p4157_p3 = pnand %p4155_p6, %p5544_p5 }
 0x25c   : > { %p4162_p1 = por %p4161_p12, %p4160_p2 }
 0x25d   : > { %p4158_p8 = pneg %p4157_p3 }
 0x25e   : > { %p4164_p9 = por %p4163_p0, %p4162_p1 }
 0x260   : > { %p4165_p10 = pnand %p4164_p9, %p4158_p8 }
 0x262   : > { %4168 = shalt.err (!%p4165_p10)
}
 0x263   : > { %s4169_s27 = scalar_lea.vmem %s4997_s5, 128  ;;  %s4359_s1 = smov [#allocation3]  }
 0x264   : > { %p4170_p11 = scmp.ne.s32.totalorder %s4997_s5, %s4169_s27  ;;  %s4174_s20 = sshll.u32 %s4359_s1, 4  ;;  %s4175_s20 = int_to_ptr.vmem [resolvable:$false] %s4174_s20 }
 0x265   : > { %s4176_s13 = scalar_lea.vmem %s4175_s20, 256  ;;  %p4177_p7 = scmp.lt.s32.totalorder %s4997_s5, %s4175_s20 }
 0x266   : > { %p4172_p13 = pnand %p4170_p11, %p5544_p5  ;;  %p4178_p6 = scmp.lt.s32.totalorder %s4176_s13, %s4169_s27 }
 0x268   : > { %p4173_p4 = pneg %p4172_p13  ;;  %p4179_p3 = por %p4178_p6, %p4177_p7 }
 0x26a   : > { %p4180_p2 = pnand %p4179_p3, %p4173_p4 }
 0x26c   : > { %4183 = shalt.err (!%p4180_p2)
}
 0x26d   : > { %p5545_p8 = scmp.ne.s32.totalorder %s5527_s18, 0  ;;  %s816_s9 = scalar_lea.vmem [#allocation8], %s4774_s0 }
 0x26e   : > { %s823_s8 = sshll.u32 %s816_s9, 4  ;;  %s4184_s30 = scalar_lea.hbm %s5003_s19, 128  ;;  %s824_s8 = int_to_ptr.vmem [resolvable:$true] %s823_s8 }
 0x26f   : > { %3431 = dma.hbm_to_vmem [thread:$0]  (!%p5545_p8), %s4994_s3, 128, %s4997_s5, %s776_s15  }
 0x270   : > { %p4185_p12 = scmp.ne.s32.totalorder %s5003_s19, %s4184_s30  ;;  %s4189_s12 = scalar_lea.hbm %s5542_s10, 256 }
 0x271   : > { %p4190_p9 = scmp.lt.u32.totalorder %s5003_s19, %s5542_s10  ;;  %p4191_p10 = scmp.lt.u32.totalorder %s4189_s12, %s4184_s30 }
 0x272   : > { %p4187_p1 = pnand %p4185_p12, %p5544_p5  ;;  %p4193_p13 = scmp.lt.u32.totalorder %s4184_s30, %s5003_s19 }
 0x273   : > { %p4192_p11 = por %p4191_p10, %p4190_p9 }
 0x274   : > { %p4188_p0 = pneg %p4187_p1 }
 0x275   : > { %p4194_p4 = por %p4193_p13, %p4192_p11 }
 0x277   : > { %p4195_p7 = pnand %p4194_p4, %p4188_p0 }
 0x279   : > { %4198 = shalt.err (!%p4195_p7)
}
 0x27a   : > { %s4199_s0 = scalar_lea.vmem %s824_s8, 128  ;;  %s4360_s3 = smov [#allocation8]  }
 0x27b   : > { %p4200_p6 = scmp.ne.s32.totalorder %s824_s8, %s4199_s0  ;;  %s4204_s5 = sshll.u32 %s4360_s3, 4  ;;  %s4205_s5 = int_to_ptr.vmem [resolvable:$false] %s4204_s5 }
 0x27c   : > { %s4206_s15 = scalar_lea.vmem %s4205_s5, 256  ;;  %p4207_p12 = scmp.lt.s32.totalorder %s824_s8, %s4205_s5 }
 0x27d   : > { %p4202_p3 = pnand %p4200_p6, %p5544_p5  ;;  %p4208_p1 = scmp.lt.s32.totalorder %s4206_s15, %s4199_s0 }
 0x27f   : > { %p4203_p2 = pneg %p4202_p3  ;;  %p4209_p8 = por %p4208_p1, %p4207_p12 }
 0x281   : > { %p4210_p9 = pnand %p4209_p8, %p4203_p2 }
 0x283   : > { %4213 = shalt.err (!%p4210_p9)
}
 0x284   : > { %p5546_p10 = scmp.ne.s32.totalorder %s5527_s18, 0  ;;  %s5547_s20 = sld [smem:[#allocation51_spill]] }
 0x286   : > { %3437 = dma.hbm_to_vmem [thread:$0]  (!%p5546_p10), %s5003_s19, 128, %s824_s8, %s4797_s11  }
 0x28a   : > { %p5548_p0 = scmp.ne.s32.totalorder %s5547_s20, 0 }
 0x28b   : > { %s5050_s4 = sand.u32 (!%p5548_p0), 1, %s4320_s25   ;;  %p5549_p5 = scmp.ne.s32.totalorder (!%p5548_p0), %s5524_s16, 0 }
 0x28c   : > { %832 = sbr.rel (%p5548_p0) target bundleno = 5205 (0x1455), region = 104  ;;  %s5053_s13 = sshll.u32 (!%p5548_p0), %s5050_s4, 3 }
 0x28d   : > { %s835_s9 = scalar_lea.sflag (!%p5548_p0), [#allocation4], %s5050_s4  ;;  %s838_s30 = scalar_lea.vmem (!%p5548_p0), [#allocation3], %s5053_s13 }
 0x293   : > { %4267 = dma.done.wait (%p5549_p5), %s835_s9, 128  }
 0x294   : > { %4269 = vsyncadd (%p5549_p5), %s835_s9, 4294967168  ;;  %s843_s11 = sand.u32 1, %s4515_s29   ;;  %s847_s19 = scalar_lea.vmem [#allocation6], %s5053_s13 }
 0x295   : > { %s844_s18 = scalar_lea.sflag [#allocation7], %s843_s11 }
 0x296   : > { %4271 = dma.done.wait (%p5549_p5), %s844_s18, 256  }
 0x297   : > { %4273 = vsyncadd (%p5549_p5), %s844_s18, 4294967040  ;;  %s856_s8 = scalar_lea.vmem [#allocation8], %s5053_s13  ;;  %p5550_p8 = scmp.eq.s32.totalorder %s4515_s29, 0 }
 0x299   : > { %4275 = dma.done.wait (%p5550_p8), [#allocation10], 784   ;;  %p5551_p11 = pmov %p5550_p8 }
 0x29a   : > { %p5552_p13 = pmov %p5550_p8 }
 0x29b   : > { %4277 = vsyncadd (%p5551_p11), [#allocation10], 4294966512 }
 0x29c   : > { %4279 = dma.done.wait (%p5552_p13), [#allocation13], 272   ;;  %p5553_p4 = pmov %p5550_p8 }
 0x29e   : > { %4281 = vsyncadd (%p5553_p4), [#allocation13], 4294967024  ;;  %p5554_p7 = pmov %p5553_p4 }
 0x29f   : > { %p5555_p6 = pmov %p5553_p4 }
 0x2a0   : > { %4283 = dma.done.wait (%p5554_p7), [#allocation16], 32  }
 0x2a1   : > { %4285 = vsyncadd (%p5555_p6), [#allocation16], 4294967264  ;;  %p5556_p3 = pmov %p5553_p4 }
 0x2a3   : > { %4287 = dma.done.wait (%p5556_p3), [#allocation19], 784   ;;  %p5557_p2 = pmov %p5556_p3 }
 0x2a5   : > { %4289 = vsyncadd (%p5557_p2), [#allocation19], 4294966512  ;;  %p5558_p12 = pmov %p5557_p2 }
 0x2a6   : > { %p5559_p1 = pmov %p5557_p2 }
 0x2a7   : > { %4291 = dma.done.wait (%p5558_p12), [#allocation22], 272  }
 0x2a8   : > { %4293 = vsyncadd (%p5559_p1), [#allocation22], 4294967024  ;;  %p5560_p9 = pmov %p5559_p1 }
 0x2a9   : > { %p5561_p10 = pmov %p5559_p1 }
 0x2aa   : > { %4295 = dma.done.wait (%p5560_p9), [#allocation25], 32  }
 0x2ab   : > { %4297 = vsyncadd (%p5561_p10), [#allocation25], 4294967264  ;;  %p5562_p0 = pmov %p5559_p1 }
 0x2ad   : > { %4299 = dma.done.wait (%p5562_p0), [#allocation28], 528   ;;  %p5563_p5 = pmov %p5562_p0 }
 0x2ae   : > { %p5564_p8 = pmov %p5562_p0 }
 0x2af   : > { %4301 = vsyncadd (%p5563_p5), [#allocation28], 4294966768 }
 0x2b0   : > { %4303 = dma.done.wait (%p5564_p8), [#allocation31], 272   ;;  %p5565_p11 = pmov %p5562_p0 }
 0x2b1   : > { %p5566_p13 = pmov %p5562_p0 }
 0x2b2   : > { %4305 = vsyncadd (%p5565_p11), [#allocation31], 4294967024 }
 0x2b3   : > { %4307 = dma.done.wait (%p5566_p13), [#allocation34], 32   ;;  %p5567_p4 = pmov %p5562_p0 }
 0x2b4   : > { %v4361_v0 = vmov 0.0   ;;  %vm4362_vm0 = vmmov 0   ;;  %vm1029_vm1 = vcmask 261120   ;;  %v3560_v1 = vld [vmem:[#allocation9 + $0x10] sm:$0xff]   ;;  %v3561_v2 = vld [vmem:[#allocation9 + $0x18] sm:$0xff]   ;;  %v3562_v4 = vld [vmem:[#allocation9 + $0x20] sm:$0xff]  }
 0x2b5   : > { %4309 = vsyncadd (%p5567_p4), [#allocation34], 4294967264  ;;  %3129 = vmatprep.subr.bf16.mxu1 %v4361_v0  ;;  %3121 = vmatprep.subr.bf16.mxu0 %v4361_v0  ;;  %v1108_v3 = vsel %vm1029_vm1, %v3560_v1, 0  ;;  %v3563_v5 = vld [vmem:[#allocation9] sm:$0xff]   ;;  %v3565_v7 = vld [vmem:[#allocation9 + $0x8] sm:$0xff]   ;;  %v1111_v8 = vsel %vm1029_vm1, %v3561_v2, 0 }
 0x2b6   : > { %3137 = vmatprep.mubr.msk.bf16.mxu1 %vm4362_vm0, %v4361_v0  ;;  %3125 = vmatprep.mubr.msk.bf16.mxu0 %vm4362_vm0, %v4361_v0  ;;  %v1034_v6 = vsel %vm1029_vm1, %v3563_v5, 0  ;;  %v2997_v9 = vld [vmem:[#allocation11] ss:$0 sm:$0xff]  ;;  %v1114_v10 = vsel %vm1029_vm1, %v3562_v4, 0  ;;  %v1037_v11 = vsel %vm1029_vm1, %v3565_v7, 0  ;;  %s4363_s29 = smov 96  }
 0x2b7   : > { %3130 = vmatpush3.bf16.xpose.msra.mxu1 %v1108_v3  ;;  %3122 = vmatpush3.bf16.xpose.msra.mxu0 %v1034_v6  ;;  %v5121_v12 = vld [vmem:[%s838_s30] sm:$0xff]  ;;  %v3564_v14 = vld [vmem:[#allocation9 + $0x28] sm:$0xff]   ;;  %vm1162_vm2 = vcmask 64512   ;;  %s4364_s16 = smov 120   ;;  %s4365_s14 = smov 112   ;;  %vm1225_vm3 = vcmask 1043456  }
 0x2b8   : > { %3131 = vmatprep.subr.bf16.mxu1 %v4361_v0  ;;  %3123 = vmatprep.subr.bf16.mxu0 %v4361_v0  ;;  %v1012_v13 = vpack.c.bf16 %v5121_v12, %v5121_v12  ;;  %v1117_v15 = vsel %vm1029_vm1, %v3564_v14, 0  ;;  %v1079_v16 = vld [vmem:[%s847_s19] sm:$0xff]  ;;  %s4366_s7 = smov 104   ;;  %s4367_s12 = smov 88   ;;  %vm1387_vm4 = vcmask 130112   ;;  %vm1503_vm5 = vcmask 195712  }
 0x2b9   : > { %1101 = vrot.lane.b32.xlu0 %v2997_v9, %s4363_s29  ;;  %v1080_v17 = vpack.c.bf16 %v1079_v16, %v1079_v16  ;;  %s4368_s27 = smov 80   ;;  %s4369_s1 = smov 72   ;;  %vm1619_vm6 = vcmask 261312   ;;  %vm2556_vm7 = vcmask 523264  }
 0x2ba   : > { %s4370_s0 = smov 8   ;;  %s4371_s3 = smov 16  }
 0x2bb   : > { %s4372_s5 = smov 24   ;;  %s5568_s15 = sld [smem:[#allocation49_spill]] }
 0x2bc   : > { %s996_s9 = scalar_lea.vmem [#allocation36], %s5053_s13  ;;  %s5569_s19 = sld [smem:[#allocation74_spill]] }
 0x2bd   : > { %s2652_s30 = sshll.u32 %s996_s9, 4  ;;  %p5570_p6 = scmp.ne.s32.totalorder %s5525_s23, 0  ;;  %s5369_s30 = int_to_ptr.vmem [resolvable:$true] %s2652_s30 }
 0x2be   : > { %s4373_s13 = smov [#allocation36]  }
 0x2bf   : > { %3132 = vmatpush3.bf16.xpose.msra.mxu1 %v1111_v8  ;;  %3124 = vmatpush3.bf16.xpose.msra.mxu0 %v1037_v11 }
 0x2c0   : > { %3133 = vmatprep.subr.bf16.mxu1 %v4361_v0  ;;  %3141 = vmatprep.subr.bf16.mxu0 %v4361_v0 }
 0x2c1   : > { %s3056_s20 = sshll.u32 %s5568_s15, 7 }
 0x2c6   : > { %3126 = vmatmul.mubr.msk.bf16.vlgmr.msra.gmra.mrb[0].mxu0 %vm1029_vm1, %v1012_v13 }
 0x2c7   : > { %3134 = vmatpush3.bf16.xpose.msra.mxu1 %v1114_v10  ;;  %3143 = vmatprep.mubr.msk.bf16.mxu0 %vm4362_vm0, %v4361_v0 }
 0x2c8   : > { %3135 = vmatprep.subr.bf16.mxu1 %v4361_v0 }
 0x2cf   : > { %3136 = vmatpush3.bf16.xpose.msra.mxu1 %v1117_v15 }
 0x2d0   : > { %3159 = vmatprep.subr.bf16.mxu1 %v4361_v0 }
 0x2d6   : > { %3138 = vmatmul.mubr.msk.bf16.vlgmr.msra.gmra.mrb[0].mxu1 %vm1029_vm1, %v1080_v17 }
 0x2d7   : > { %3161 = vmatprep.mubr.msk.bf16.mxu1 %vm4362_vm0, %v4361_v0 }
 0x32b   : > { %v1102_v22 = vpop.permute.xlu0 %1101 }
 0x399   : > { %v1073_v18 = vpop.f32.mrb[0].mxu0 }
 0x39a   : > { %v3127_v19 = vpop.f32.mrb[1].mxu0  ;;  %v1074_v26 = vadd.f32 %v2997_v9, %v1073_v18 }
 0x39b   : > { %v1076_v20 = vpop.f32.mrb[2].mxu0 }
 0x39c   : > { %v3128_v21 = vpop.f32.mrb[3].mxu0  ;;  %v1159_v30 = vmul.f32 0.35355338, %v1074_v26 }
 0x39e   : > { %v1160_v32 = vpack.c.bf16 %v1159_v30, %v1159_v30 }
 0x3a9   : > { %v1153_v23 = vpop.f32.mrb[0].mxu1 }
 0x3aa   : > { %v1154_v24 = vadd.f32 %v1153_v23, %v1102_v22  ;;  %v3139_v25 = vpop.f32.mrb[1].mxu1 }
 0x3ab   : > { %v1156_v27 = vpop.f32.mrb[2].mxu1 }
 0x3ac   : > { %v5137_v28 = vpack.c.bf16 %v1154_v24, %v1154_v24  ;;  %v3140_v29 = vpop.f32.mrb[3].mxu1 }
 0x3ae   : > { %1220 = vrot.lane.b32.xlu1 %v5137_v28, %s4363_s29  ;;  %v1167_v31 = vsel %vm1162_vm2, %v5137_v28, 0 }
 0x3af   : > { %3142 = vmatpush3.bf16.xpose.msra.mxu0 %v1167_v31 }
 0x3b0   : > { %3147 = vmatprep.subr.bf16.mxu0 %v4361_v0 }
 0x3b2   : > { %1275 = vrot.lane.b32.xlu1 %v5137_v28, %s4364_s16 }
 0x3b6   : > { %1273 = vrot.lane.b32.xlu1 %v1160_v32, %s4364_s16  ;;  %3144 = vmatmul.mubr.msk.bf16.vlgmr.msra.gmra.mrb[4].mxu0 %vm1162_vm2, %v1160_v32 }
 0x3b7   : > { %3149 = vmatprep.mubr.msk.bf16.mxu0 %vm4362_vm0, %v4361_v0 }
 0x3ba   : > { %1391 = vrot.lane.b32.xlu1 %v5137_v28, %s4365_s14 }
 0x3be   : > { %1389 = vrot.lane.b32.xlu1 %v1160_v32, %s4365_s14 }
 0x3c2   : > { %1507 = vrot.lane.b32.xlu1 %v5137_v28, %s4366_s7 }
 0x3c6   : > { %1505 = vrot.lane.b32.xlu1 %v1160_v32, %s4366_s7 }
 0x420   : > { %v1221_v33 = vpop.permute.xlu1 %1220 }
 0x421   : > { %v1227_v34 = vsel %vm1225_vm3, %v1221_v33, 0 }
 0x422   : > { %3148 = vmatpush3.bf16.msra.mxu0 %v1227_v34 }
 0x423   : > { %3153 = vmatprep.subr.bf16.mxu0 %v4361_v0 }
 0x424   : > { %v1276_v45 = vpop.permute.xlu1 %1275 }
 0x425   : > { %v1281_v49 = vsel %vm1162_vm2, %v1276_v45, 0 }
 0x428   : > { %v1274_v46 = vpop.permute.xlu1 %1273 }
 0x42c   : > { %v1392_v50 = vpop.permute.xlu1 %1391 }
 0x42d   : > { %v1397_v52 = vsel %vm1162_vm2, %v1392_v50, 0  ;;  %v3567_v50 = vld [vmem:[#allocation12 + $0x8] sm:$0xff]  }
 0x430   : > { %v1390_v51 = vpop.permute.xlu1 %1389 }
 0x434   : > { %v1508_v53 = vpop.permute.xlu1 %1507 }
 0x435   : > { %v1513_v54 = vsel %vm1162_vm2, %v1508_v53, 0  ;;  %v1651_v53 = vsel %vm1029_vm1, %v3567_v50, 0 }
 0x438   : > { %v1506_v55 = vpop.permute.xlu1 %1505 }
 0x489   : > { %v1203_v35 = vpop.f32.mrb[4].mxu0 }
 0x48a   : > { %v3145_v36 = vpop.f32.mrb[5].mxu0  ;;  %v1209_v37 = vsel %vm1162_vm2, %v1203_v35, -inf }
 0x48b   : > { %1210 = vmax.xlane.f32.xlu0 %v1209_v37  ;;  %v1206_v38 = vpop.f32.mrb[6].mxu0 }
 0x48c   : > { %v3146_v39 = vpop.f32.mrb[7].mxu0 }
 0x4a1   : > { %1333 = vrot.lane.b32.xlu0 %v5137_v28, %s4367_s12 }
 0x518   : > { %v1211_v40 = vpop.xlane.xlu0 %1210 }
 0x519   : > { %v1212_v41 = vsub.f32 %v1203_v35, %v1211_v40 }
 0x51b   : > { %v1213_v42 = vmul.f32 1.442695, %v1212_v41 }
 0x51c   : > { %v1334_v43 = vpop.permute.xlu0 %1333 }
 0x51d   : > { %3582 = vpow2.f32 %v1213_v42  ;;  %v1339_v44 = vsel %vm1225_vm3, %v1334_v43, 0  ;;  %v3566_v42 = vld [vmem:[#allocation12] sm:$0xff]  }
 0x51e   : > { %3160 = vmatpush3.bf16.msra.mxu1 %v1339_v44  ;;  %v1648_v45 = vsel %vm1029_vm1, %v3566_v42, 0 }
 0x51f   : > { %3171 = vmatprep.subr.bf16.mxu1 %v4361_v0 }
 0x527   : > { %v5163_v47 = vpop.eup %3582 }
 0x528   : > { %v1218_v48 = vpack.c.bf16 %v5163_v47, %v5163_v47  ;;  %v1215_v35 = vsel %vm1162_vm2, %v5163_v47, 0.0 }
 0x52a   : > { %3150 = vmatmul.mubr.msk.bf16.vlgmr.msra.gmra.mrb[8].mxu0 %vm1162_vm2, %v1218_v48 }
 0x52b   : > { %3154 = vmatpush3.bf16.xpose.msra.mxu0 %v1281_v49  ;;  %3155 = vmatprep.mubr.msk.bf16.mxu0 %vm4362_vm0, %v4361_v0 }
 0x52c   : > { %3165 = vmatprep.subr.bf16.mxu0 %v4361_v0 }
 0x532   : > { %3156 = vmatmul.mubr.msk.bf16.vlgmr.msra.gmra.mrb[12].mxu0 %vm1162_vm2, %v1274_v46 }
 0x533   : > { %3166 = vmatpush3.bf16.xpose.msra.mxu0 %v1397_v52  ;;  %3167 = vmatprep.mubr.msk.bf16.mxu0 %vm4362_vm0, %v4361_v0 }
 0x534   : > { %3177 = vmatprep.subr.bf16.mxu0 %v4361_v0 }
 0x53a   : > { %3168 = vmatmul.mubr.msk.bf16.vlgmr.msra.gmra.mrb[16].mxu0 %vm1162_vm2, %v1390_v51 }
 0x53b   : > { %3178 = vmatpush3.bf16.xpose.msra.mxu0 %v1513_v54  ;;  %3179 = vmatprep.mubr.msk.bf16.mxu0 %vm4362_vm0, %v4361_v0 }
 0x53c   : > { %3189 = vmatprep.subr.bf16.mxu0 %v4361_v0 }
 0x542   : > { %3180 = vmatmul.mubr.msk.bf16.vlgmr.msra.gmra.mrb[20].mxu0 %vm1162_vm2, %v1506_v55 }
 0x543   : > { %3193 = vmatprep.mubr.msk.bf16.mxu0 %vm4362_vm0, %v4361_v0  ;;  %3190 = vmatpush3.bf16.xpose.msra.mxu0 %v1648_v45 }
 0x544   : > { %3191 = vmatprep.subr.bf16.mxu0 %v4361_v0 }
 0x54b   : > { %3192 = vmatpush3.bf16.xpose.msra.mxu0 %v1651_v53 }
 0x54c   : > { %3205 = vmatprep.subr.bf16.mxu0 %v4361_v0 }
 0x5fd   : > { %v5185_v56 = vpop.f32.mrb[8].mxu0 }
 0x5fe   : > { %v3151_v57 = vpop.f32.mrb[9].mxu0 }
 0x5ff   : > { %v1266_v58 = vpop.f32.mrb[10].mxu0 }
 0x600   : > { %v3152_v59 = vpop.f32.mrb[11].mxu0 }
 0x605   : > { %v1317_v60 = vpop.f32.mrb[12].mxu0 }
 0x606   : > { %v3157_v61 = vpop.f32.mrb[13].mxu0  ;;  %v1323_v62 = vsel %vm1162_vm2, %v1317_v60, -inf }
 0x607   : > { %1324 = vmax.xlane.f32.xlu1 %v1323_v62  ;;  %v1320_v63 = vpop.f32.mrb[14].mxu0 }
 0x608   : > { %v3158_v1 = vpop.f32.mrb[15].mxu0 }
 0x60d   : > { %v1433_v2 = vpop.f32.mrb[16].mxu0 }
 0x60e   : > { %v3169_v3 = vpop.f32.mrb[17].mxu0  ;;  %v1439_v4 = vsel %vm1162_vm2, %v1433_v2, -inf }
 0x60f   : > { %1440 = vmax.xlane.f32.xlu0 %v1439_v4  ;;  %v1436_v5 = vpop.f32.mrb[18].mxu0 }
 0x610   : > { %v3170_v6 = vpop.f32.mrb[19].mxu0 }
 0x611   : > { %v3014_v6 = vld [vmem:[#allocation14] ss:$0 sm:$0xff] }
 0x615   : > { %v1549_v7 = vpop.f32.mrb[20].mxu0 }
 0x616   : > { %v3181_v8 = vpop.f32.mrb[21].mxu0  ;;  %v1555_v9 = vsel %vm1162_vm2, %v1549_v7, -inf }
 0x617   : > { %1556 = vmax.xlane.f32.xlu0 %v1555_v9  ;;  %v1552_v10 = vpop.f32.mrb[22].mxu0 }
 0x618   : > { %1449 = vrot.lane.b32.xlu1 %v5137_v28, %s4368_s27  ;;  %v3182_v11 = vpop.f32.mrb[23].mxu0 }
 0x62d   : > { %1565 = vrot.lane.b32.xlu0 %v5137_v28, %s4369_s1 }
 0x694   : > { %v1325_v13 = vpop.xlane.xlu1 %1324 }
 0x695   : > { %v1326_v14 = vsub.f32 %v1317_v60, %v1325_v13 }
 0x697   : > { %v1327_v15 = vmul.f32 1.442695, %v1326_v14 }
 0x698   : > { %v1450_v20 = vpop.permute.xlu1 %1449 }
 0x699   : > { %3584 = vpow2.f32 %v1327_v15  ;;  %v1455_v25 = vsel %vm1225_vm3, %v1450_v20, 0  ;;  %v3568_v15 = vld [vmem:[#allocation18 + $0x10] sm:$0xff]  }
 0x69c   : > { %v1441_v16 = vpop.xlane.xlu0 %1440 }
 0x69d   : > { %v1442_v17 = vsub.f32 %v1433_v2, %v1441_v16  ;;  %v1832_v16 = vsel %vm1029_vm1, %v3568_v15, 0 }
 0x69f   : > { %v1443_v18 = vmul.f32 1.442695, %v1442_v17  ;;  %v3569_v17 = vld [vmem:[#allocation18 + $0x18] sm:$0xff]  }
 0x6a1   : > { %3586 = vpow2.f32 %v1443_v18  ;;  %v1835_v18 = vsel %vm1029_vm1, %v3569_v17, 0 }
 0x6a3   : > { %v3585_v19 = vpop.eup %3584 }
 0x6a4   : > { %v1557_v21 = vpop.xlane.xlu0 %1556  ;;  %v1329_v22 = vsel %vm1162_vm2, %v3585_v19, 0.0  ;;  %v1332_v23 = vpack.c.bf16 %v3585_v19, %v3585_v19  ;;  %v3570_v19 = vld [vmem:[#allocation18 + $0x20] sm:$0xff]  }
 0x6a5   : > { %v1558_v24 = vsub.f32 %v1549_v7, %v1557_v21  ;;  %1330 = vadd.xlane.f32.xlu0 %v1329_v22  ;;  %v1838_v20 = vsel %vm1029_vm1, %v3570_v19, 0 }
 0x6a6   : > { %3162 = vmatmul.mubr.msk.bf16.vlgmr.msra.gmra.mrb[4].mxu1 %vm1162_vm2, %v1332_v23 }
 0x6a7   : > { %v1559_v26 = vmul.f32 1.442695, %v1558_v24  ;;  %3172 = vmatpush3.bf16.msra.mxu1 %v1455_v25  ;;  %3173 = vmatprep.mubr.msk.bf16.mxu1 %vm4362_vm0, %v4361_v0  ;;  %v3571_v25 = vld [vmem:[#allocation18 + $0x28] sm:$0xff]  }
 0x6a8   : > { %3183 = vmatprep.subr.bf16.mxu1 %v4361_v0  ;;  %v1566_v28 = vpop.permute.xlu0 %1565 }
 0x6a9   : > { %3588 = vpow2.f32 %v1559_v26  ;;  %v1571_v31 = vsel %vm1225_vm3, %v1566_v28, 0  ;;  %v3572_v26 = vld [vmem:[#allocation18] sm:$0xff]  }
 0x6aa   : > { %v1758_v28 = vsel %vm1029_vm1, %v3572_v26, 0 }
 0x6ab   : > { %v3587_v27 = vpop.eup %3586 }
 0x6ac   : > { %v1445_v29 = vsel %vm1162_vm2, %v3587_v27, 0.0  ;;  %v1448_v30 = vpack.c.bf16 %v3587_v27, %v3587_v27  ;;  %v1841_v27 = vsel %vm1029_vm1, %v3571_v25, 0 }
 0x6ad   : > { %1446 = vadd.xlane.f32.xlu1 %v1445_v29  ;;  %v1803_v29 = vld [vmem:[%s856_s8] sm:$0xff]  ;;  %s5367_s8 = scalar_lea.hbm %s5569_s19, %s3056_s20 }
 0x6ae   : > { %3174 = vmatmul.mubr.msk.bf16.vlgmr.msra.gmra.mrb[8].mxu1 %vm1162_vm2, %v1448_v30  ;;  %v1804_v30 = vpack.c.bf16 %v1803_v29, %v1803_v29 }
 0x6af   : > { %3184 = vmatpush3.bf16.msra.mxu1 %v1571_v31  ;;  %3185 = vmatprep.mubr.msk.bf16.mxu1 %vm4362_vm0, %v4361_v0  ;;  %v3573_v31 = vld [vmem:[#allocation18 + $0x8] sm:$0xff]  }
 0x6b0   : > { %3197 = vmatprep.subr.bf16.mxu1 %v4361_v0 }
 0x6b3   : > { %v3589_v32 = vpop.eup %3588 }
 0x6b4   : > { %v1561_v33 = vsel %vm1162_vm2, %v3589_v32, 0.0  ;;  %v1564_v34 = vpack.c.bf16 %v3589_v32, %v3589_v32  ;;  %v1761_v32 = vsel %vm1029_vm1, %v3573_v31, 0 }
 0x6b5   : > { %1562 = vadd.xlane.f32.xlu0 %v1561_v33  ;;  %v3020_v33 = vld [vmem:[#allocation20] ss:$0 sm:$0xff] }
 0x6b6   : > { %3186 = vmatmul.mubr.msk.bf16.vlgmr.msra.gmra.mrb[12].mxu1 %vm1162_vm2, %v1564_v34 }
 0x6b7   : > { %3201 = vmatprep.mubr.msk.bf16.mxu1 %vm4362_vm0, %v4361_v0 }
 0x6b8   : > { %3198 = vmatpush3.bf16.xpose.msra.mxu1 %v1758_v28 }
 0x6b9   : > { %1216 = vadd.xlane.f32.xlu0 %v1215_v35  ;;  %3199 = vmatprep.subr.bf16.mxu1 %v4361_v0 }
 0x6c0   : > { %3200 = vmatpush3.bf16.xpose.msra.mxu1 %v1761_v32 }
 0x6c1   : > { %3217 = vmatprep.subr.bf16.mxu1 %v4361_v0 }
 0x732   : > { %v1331_v36 = vpop.xlane.xlu0 %1330 }
 0x73a   : > { %v1447_v41 = vpop.xlane.xlu1 %1446 }
 0x742   : > { %v1563_v37 = vpop.xlane.xlu0 %1562 }
 0x746   : > { %v1217_v38 = vpop.xlane.xlu0 %1216 }
 0x747   : > { %3590 = vrcp.f32 %v1217_v38  ;;  %v3018_v38 = vld [vmem:[#allocation15] ss:$0 sm:$0xff] }
 0x748   : > { %3592 = vrcp.f32 %v1331_v36 }
 0x749   : > { %3594 = vrcp.f32 %v1447_v41 }
 0x74a   : > { %3596 = vrcp.f32 %v1563_v37 }
 0x751   : > { %v3591_v39 = vpop.eup %3590 }
 0x752   : > { %v1270_v40 = vmul.f32 %v3591_v39, %v5185_v56  ;;  %v3593_v43 = vpop.eup %3592 }
 0x753   : > { %v3595_v51 = vpop.eup %3594 }
 0x754   : > { %1271 = vst.msk [vmem:[#allocation2] sm:$0xff] %vm1162_vm2, %v1270_v40  ;;  %v3597_v58 = vpop.eup %3596  ;;  %v3019_v40 = vld [vmem:[#allocation17] ss:$0 sm:$0xff] }
 0x779   : > { %v1375_v44 = vpop.f32.mrb[4].mxu1 }
 0x77a   : > { %v1382_v46 = vmul.f32 %v3593_v43, %v1375_v44  ;;  %v3163_v47 = vpop.f32.mrb[5].mxu1 }
 0x77b   : > { %v1378_v48 = vpop.f32.mrb[6].mxu1 }
 0x77c   : > { %v3164_v49 = vpop.f32.mrb[7].mxu1  ;;  %1384 = vrot.lane.b32.xlu0 %v1382_v46, %s4370_s0 }
 0x781   : > { %v1491_v52 = vpop.f32.mrb[8].mxu1 }
 0x782   : > { %v1498_v54 = vmul.f32 %v3595_v51, %v1491_v52  ;;  %v3175_v55 = vpop.f32.mrb[9].mxu1 }
 0x783   : > { %v1494_v56 = vpop.f32.mrb[10].mxu1 }
 0x784   : > { %v3176_v57 = vpop.f32.mrb[11].mxu1  ;;  %1500 = vrot.lane.b32.xlu1 %v1498_v54, %s4371_s3 }
 0x789   : > { %v1607_v59 = vpop.f32.mrb[12].mxu1 }
 0x78a   : > { %v1614_v60 = vmul.f32 %v3597_v58, %v1607_v59  ;;  %v3187_v61 = vpop.f32.mrb[13].mxu1 }
 0x78b   : > { %v1610_v62 = vpop.f32.mrb[14].mxu1 }
 0x78c   : > { %v3188_v63 = vpop.f32.mrb[15].mxu1  ;;  %1616 = vrot.lane.b32.xlu0 %v1614_v60, %s4372_s5 }
 0x7ee   : > { %v1385_v1 = vpop.permute.xlu0 %1384 }
 0x7ef   : > { %1388 = vst.msk [vmem:[#allocation2] sm:$0xff] %vm1387_vm4, %v1385_v1 }
 0x7f6   : > { %v1501_v2 = vpop.permute.xlu1 %1500 }
 0x7f7   : > { %1504 = vst.msk [vmem:[#allocation2] sm:$0xff] %vm1503_vm5, %v1501_v2 }
 0x7fe   : > { %v1617_v3 = vpop.permute.xlu0 %1616 }
 0x7ff   : > { %1620 = vst.msk [vmem:[#allocation2] sm:$0xff] %vm1619_vm6, %v1617_v3 }
 0x806   : > { %v1621_v4 = vld [vmem:[#allocation2] sm:$0xff] }
 0x807   : > { %v1626_v5 = vpack.c.bf16 %v1621_v4, %v1621_v4 }
 0x809   : > { %3194 = vmatmul.mubr.msk.bf16.vlgmr.msra.gmra.mrb[24].mxu0 %vm1029_vm1, %v1626_v5 }
 0x80a   : > { %3213 = vmatprep.mubr.msk.bf16.mxu0 %vm4362_vm0, %v4361_v0  ;;  %3206 = vmatpush3.bf16.xpose.msra.mxu0 %v1832_v16 }
 0x80b   : > { %3207 = vmatprep.subr.bf16.mxu0 %v4361_v0 }
 0x812   : > { %3208 = vmatpush3.bf16.xpose.msra.mxu0 %v1835_v18 }
 0x813   : > { %3209 = vmatprep.subr.bf16.mxu0 %v4361_v0 }
 0x81a   : > { %3210 = vmatpush3.bf16.xpose.msra.mxu0 %v1838_v20 }
 0x81b   : > { %3211 = vmatprep.subr.bf16.mxu0 %v4361_v0 }
 0x822   : > { %3212 = vmatpush3.bf16.xpose.msra.mxu0 %v1841_v27 }
 0x823   : > { %3241 = vmatprep.subr.bf16.mxu0 %v4361_v0 }
 0x829   : > { %3214 = vmatmul.mubr.msk.bf16.vlgmr.msra.gmra.mrb[28].mxu0 %vm1029_vm1, %v1804_v30 }
 0x82a   : > { %3243 = vmatprep.mubr.msk.bf16.mxu0 %vm4362_vm0, %v4361_v0 }
 0x8dc   : > { %v1687_v7 = vpop.f32.mrb[24].mxu0 }
 0x8dd   : > { %v1688_v8 = vadd.f32 %v3014_v6, %v1687_v7  ;;  %v3195_v9 = vpop.f32.mrb[25].mxu0 }
 0x8de   : > { %v1690_v10 = vpop.f32.mrb[26].mxu0 }
 0x8df   : > { %v3196_v11 = vpop.f32.mrb[27].mxu0  ;;  %v1693_v13 = vadd.f32 %v1688_v8, %v5121_v12 }
 0x8e1   : > { %v1696_v14 = vsel %vm1029_vm1, %v1693_v13, 0.0 }
 0x8e2   : > { %1697 = vadd.xlane.f32.xlu0 %v1696_v14 }
 0x8f8   : > { %1825 = vrot.lane.b32.xlu0 %v3020_v33, %s4363_s29 }
 0x8fc   : > { %v1877_v45 = vpop.f32.mrb[28].mxu0 }
 0x8fd   : > { %v3215_v46 = vpop.f32.mrb[29].mxu0 }
 0x8fe   : > { %v1880_v48 = vpop.f32.mrb[30].mxu0 }
 0x8ff   : > { %v3216_v50 = vpop.f32.mrb[31].mxu0 }
 0x96f   : > { %v1698_v12 = vpop.xlane.xlu0 %1697 }
 0x970   : > { %v1700_v21 = vmul.f32 0.03125, %v1698_v12 }
 0x972   : > { %v1701_v22 = vsub.f32 %v1693_v13, %v1700_v21 }
 0x973   : > { %v1826_v44 = vpop.permute.xlu0 %1825 }
 0x974   : > { %v1702_v23 = vmul.f32 %v1701_v22, %v1701_v22  ;;  %v1878_v47 = vadd.f32 %v1877_v45, %v1826_v44 }
 0x976   : > { %v1703_v24 = vsel %vm1029_vm1, %v1702_v23, 0.0  ;;  %v5255_v49 = vpack.c.bf16 %v1878_v47, %v1878_v47 }
 0x977   : > { %1704 = vadd.xlane.f32.xlu1 %v1703_v24 }
 0x978   : > { %1997 = vrot.lane.b32.xlu0 %v5255_v49, %s4364_s16  ;;  %v1890_v51 = vsel %vm1162_vm2, %v5255_v49, 0 }
 0x9ea   : > { %v1998_v6 = vpop.permute.xlu0 %1997 }
 0x9eb   : > { %v2003_v16 = vsel %vm1162_vm2, %v1998_v6, 0 }
 0xa04   : > { %v1705_v34 = vpop.xlane.xlu1 %1704 }
 0xa05   : > { %v1706_v35 = vmul.f32 0.03125, %v1705_v34 }
 0xa07   : > { %v1707_v36 = vadd.f32 1e-05, %v1706_v35 }
 0xa09   : > { %3598 = vrsqrt.f32 %v1707_v36 }
 0xa13   : > { %v3599_v37 = vpop.eup %3598 }
 0xa14   : > { %v1709_v39 = vmul.f32 %v3599_v37, %v1701_v22 }
 0xa16   : > { %v1716_v41 = vmul.f32 %v3018_v38, %v1709_v39 }
 0xa18   : > { %v5248_v42 = vadd.f32 %v3019_v40, %v1716_v41 }
 0xa1a   : > { %v1737_v43 = vpack.c.bf16 %v5248_v42, %v5248_v42 }
 0xa1c   : > { %3202 = vmatmul.mubr.msk.bf16.vlgmr.msra.gmra.mrb[16].mxu1 %vm1029_vm1, %v1737_v43 }
 0xa1d   : > { %3219 = vmatprep.mubr.msk.bf16.mxu1 %vm4362_vm0, %v4361_v0  ;;  %3218 = vmatpush3.bf16.xpose.msra.mxu1 %v1890_v51 }
 0xa1e   : > { %3223 = vmatprep.subr.bf16.mxu1 %v4361_v0 }
 0xaef   : > { %v1797_v52 = vpop.f32.mrb[16].mxu1 }
 0xaf0   : > { %v1798_v53 = vadd.f32 %v3020_v33, %v1797_v52  ;;  %v3203_v54 = vpop.f32.mrb[17].mxu1 }
 0xaf1   : > { %v1800_v55 = vpop.f32.mrb[18].mxu1 }
 0xaf2   : > { %v1883_v56 = vmul.f32 0.35355338, %v1798_v53  ;;  %v3204_v57 = vpop.f32.mrb[19].mxu1 }
 0xaf4   : > { %v1884_v58 = vpack.c.bf16 %v1883_v56, %v1883_v56 }
 0xaf6   : > { %1995 = vrot.lane.b32.xlu0 %v1884_v58, %s4364_s16  ;;  %3220 = vmatmul.mubr.msk.bf16.vlgmr.msra.gmra.mrb[20].mxu1 %vm1162_vm2, %v1884_v58  ;;  %s4214_s16 = scalar_lea.vmem %s5369_s30, 128 }
 0xaf7   : > { %3225 = vmatprep.mubr.msk.bf16.mxu1 %vm4362_vm0, %v4361_v0  ;;  %p4215_p7 = scmp.ne.s32.totalorder %s5369_s30, %s4214_s16 }
 0xaf9   : > { %p4216_p3 = pnand %p4215_p7, %p5570_p6 }
 0xafa   : > { %2110 = vrot.lane.b32.xlu0 %v1884_v58, %s4365_s14 }
 0xafb   : > { %p4217_p2 = pneg %p4216_p3 }
 0xafe   : > { %2225 = vrot.lane.b32.xlu0 %v1884_v58, %s4366_s7 }
 0xb68   : > { %v1996_v9 = vpop.permute.xlu0 %1995 }
 0xb6c   : > { %v2111_v13 = vpop.permute.xlu0 %2110 }
 0xb70   : > { %v2226_v17 = vpop.permute.xlu0 %2225 }
 0xbc9   : > { %v1926_v59 = vpop.f32.mrb[20].mxu1 }
 0xbca   : > { %v3221_v60 = vpop.f32.mrb[21].mxu1  ;;  %v1932_v61 = vsel %vm1162_vm2, %v1926_v59, -inf }
 0xbcb   : > { %1933 = vmax.xlane.f32.xlu1 %v1932_v61  ;;  %v1929_v62 = vpop.f32.mrb[22].mxu1 }
 0xbcc   : > { %v3222_v63 = vpop.f32.mrb[23].mxu1 }
 0xbdc   : > { %1943 = vrot.lane.b32.xlu1 %v5255_v49, %s4363_s29  ;;  %s2638_s29 = scalar_lea.sflag [#allocation5], %s5050_s4 }
 0xbe0   : > { %2112 = vrot.lane.b32.xlu1 %v5255_v49, %s4365_s14  ;;  %s4218_s14 = sshll.u32 %s4373_s13, 4  ;;  %s4219_s14 = int_to_ptr.vmem [resolvable:$false] %s4218_s14 }
 0xbe1   : > { %p4221_p12 = scmp.lt.s32.totalorder %s5369_s30, %s4219_s14 }
 0xbe4   : > { %2227 = vrot.lane.b32.xlu1 %v5255_v49, %s4366_s7  ;;  %s4220_s7 = scalar_lea.vmem %s4219_s14, 256 }
 0xbe5   : > { %p4222_p1 = scmp.lt.s32.totalorder %s4220_s7, %s4214_s16 }
 0xbe7   : > { %p4223_p9 = por %p4222_p1, %p4221_p12 }
 0xbe9   : > { %p4224_p10 = pnand %p4223_p9, %p4217_p2 }
 0xc58   : > { %v1934_v1 = vpop.xlane.xlu1 %1933 }
 0xc59   : > { %v1935_v2 = vsub.f32 %v1926_v59, %v1934_v1 }
 0xc5b   : > { %v1936_v3 = vmul.f32 1.442695, %v1935_v2 }
 0xc5c   : > { %v1944_v4 = vpop.permute.xlu1 %1943 }
 0xc5d   : > { %3600 = vpow2.f32 %v1936_v3  ;;  %v1949_v5 = vsel %vm1225_vm3, %v1944_v4, 0  ;;  %v3574_v4 = vld [vmem:[#allocation21] sm:$0xff]  }
 0xc5e   : > { %3224 = vmatpush3.bf16.msra.mxu1 %v1949_v5 }
 0xc5f   : > { %3229 = vmatprep.subr.bf16.mxu1 %v4361_v0 }
 0xc60   : > { %v2113_v7 = vpop.permute.xlu1 %2112 }
 0xc61   : > { %v2118_v8 = vsel %vm1162_vm2, %v2113_v7, 0  ;;  %v2367_v7 = vsel %vm1029_vm1, %v3574_v4, 0  ;;  %v3043_v4 = vld [vmem:[#allocation29] ss:$0 sm:$0xff] }
 0xc62   : > { %3242 = vmatpush3.bf16.xpose.msra.mxu0 %v2118_v8 }
 0xc63   : > { %3253 = vmatprep.subr.bf16.mxu0 %v4361_v0 }
 0xc64   : > { %v2228_v10 = vpop.permute.xlu1 %2227 }
 0xc65   : > { %v2233_v15 = vsel %vm1162_vm2, %v2228_v10, 0 }
 0xc67   : > { %v5279_v11 = vpop.eup %3600 }
 0xc68   : > { %v1941_v14 = vpack.c.bf16 %v5279_v11, %v5279_v11  ;;  %v1938_v57 = vsel %vm1162_vm2, %v5279_v11, 0.0 }
 0xc69   : > { %3244 = vmatmul.mubr.msk.bf16.vlgmr.msra.gmra.mrb[32].mxu0 %vm1162_vm2, %v2111_v13 }
 0xc6a   : > { %3226 = vmatmul.mubr.msk.bf16.vlgmr.msra.gmra.mrb[24].mxu1 %vm1162_vm2, %v1941_v14  ;;  %3254 = vmatpush3.bf16.xpose.msra.mxu0 %v2233_v15  ;;  %v3575_v14 = vld [vmem:[#allocation21 + $0x8] sm:$0xff]  }
 0xc6b   : > { %3230 = vmatpush3.bf16.xpose.msra.mxu1 %v2003_v16  ;;  %3255 = vmatprep.mubr.msk.bf16.mxu0 %vm4362_vm0, %v4361_v0 }
 0xc6c   : > { %3231 = vmatprep.mubr.msk.bf16.mxu1 %vm4362_vm0, %v4361_v0  ;;  %3235 = vmatprep.subr.bf16.mxu1 %v4361_v0 }
 0xc6d   : > { %3265 = vmatprep.subr.bf16.mxu0 %v4361_v0 }
 0xc71   : > { %3256 = vmatmul.mubr.msk.bf16.vlgmr.msra.gmra.mrb[36].mxu0 %vm1162_vm2, %v2226_v17  ;;  %v2370_v17 = vsel %vm1029_vm1, %v3575_v14, 0 }
 0xc72   : > { %3232 = vmatmul.mubr.msk.bf16.vlgmr.msra.gmra.mrb[28].mxu1 %vm1162_vm2, %v1996_v9  ;;  %3269 = vmatprep.mubr.msk.bf16.mxu0 %vm4362_vm0, %v4361_v0 }
 0xc73   : > { %3237 = vmatprep.mubr.msk.bf16.mxu1 %vm4362_vm0, %v4361_v0  ;;  %3266 = vmatpush3.bf16.xpose.msra.mxu0 %v2367_v7 }
 0xc74   : > { %3267 = vmatprep.subr.bf16.mxu0 %v4361_v0 }
 0xc7b   : > { %3268 = vmatpush3.bf16.xpose.msra.mxu0 %v2370_v17 }
 0xc7c   : > { %3285 = vmatprep.subr.bf16.mxu0 %v4361_v0 }
 0xd3c   : > { %v2154_v18 = vpop.f32.mrb[32].mxu0 }
 0xd3d   : > { %v5299_v19 = vpop.f32.mrb[24].mxu1  ;;  %v3245_v20 = vpop.f32.mrb[33].mxu0  ;;  %v2160_v12 = vsel %vm1162_vm2, %v2154_v18, -inf }
 0xd3e   : > { %v3227_v21 = vpop.f32.mrb[25].mxu1  ;;  %2161 = vmax.xlane.f32.xlu0 %v2160_v12  ;;  %v2157_v22 = vpop.f32.mrb[34].mxu0 }
 0xd3f   : > { %v1988_v23 = vpop.f32.mrb[26].mxu1  ;;  %v3246_v24 = vpop.f32.mrb[35].mxu0 }
 0xd40   : > { %v3228_v25 = vpop.f32.mrb[27].mxu1 }
 0xd44   : > { %v2269_v26 = vpop.f32.mrb[36].mxu0 }
 0xd45   : > { %v2039_v27 = vpop.f32.mrb[28].mxu1  ;;  %v3257_v28 = vpop.f32.mrb[37].mxu0  ;;  %v2275_v29 = vsel %vm1162_vm2, %v2269_v26, -inf }
 0xd46   : > { %v3233_v30 = vpop.f32.mrb[29].mxu1  ;;  %2276 = vmax.xlane.f32.xlu0 %v2275_v29  ;;  %v2272_v31 = vpop.f32.mrb[38].mxu0  ;;  %v2045_v32 = vsel %vm1162_vm2, %v2039_v27, -inf }
 0xd47   : > { %2046 = vmax.xlane.f32.xlu1 %v2045_v32  ;;  %v2042_v33 = vpop.f32.mrb[30].mxu1  ;;  %v3258_v34 = vpop.f32.mrb[39].mxu0  ;;  %v3037_v32 = vld [vmem:[#allocation23] ss:$0 sm:$0xff] }
 0xd48   : > { %v3234_v35 = vpop.f32.mrb[31].mxu1 }
 0xd58   : > { %2055 = vrot.lane.b32.xlu1 %v5255_v49, %s4367_s12 }
 0xd5c   : > { %2285 = vrot.lane.b32.xlu1 %v5255_v49, %s4369_s1  ;;  %2170 = vrot.lane.b32.xlu0 %v5255_v49, %s4368_s27 }
 0xdcb   : > { %v2162_v36 = vpop.xlane.xlu0 %2161 }
 0xdcc   : > { %v2163_v37 = vsub.f32 %v2154_v18, %v2162_v36 }
 0xdce   : > { %v2164_v38 = vmul.f32 1.442695, %v2163_v37 }
 0xdd0   : > { %3602 = vpow2.f32 %v2164_v38 }
 0xdd3   : > { %v2277_v39 = vpop.xlane.xlu0 %2276 }
 0xdd4   : > { %v2278_v40 = vsub.f32 %v2269_v26, %v2277_v39  ;;  %v2047_v41 = vpop.xlane.xlu1 %2046 }
 0xdd5   : > { %v2048_v43 = vsub.f32 %v2039_v27, %v2047_v41 }
 0xdd6   : > { %v2279_v44 = vmul.f32 1.442695, %v2278_v40  ;;  %v3576_v40 = vld [vmem:[#allocation27] sm:$0xff]  }
 0xdd7   : > { %v2049_v45 = vmul.f32 1.442695, %v2048_v43  ;;  %v2171_v52 = vpop.permute.xlu0 %2170  ;;  %v2482_v41 = vsel %vm1029_vm1, %v3576_v40, 0 }
 0xdd8   : > { %3604 = vpow2.f32 %v2279_v44  ;;  %v2056_v46 = vpop.permute.xlu1 %2055  ;;  %v2176_v56 = vsel %vm1225_vm3, %v2171_v52, 0 }
 0xdd9   : > { %3606 = vpow2.f32 %v2049_v45  ;;  %v2061_v47 = vsel %vm1225_vm3, %v2056_v46, 0 }
 0xdda   : > { %v3603_v48 = vpop.eup %3602  ;;  %3236 = vmatpush3.bf16.msra.mxu1 %v2061_v47 }
 0xddb   : > { %v2166_v50 = vsel %vm1162_vm2, %v3603_v48, 0.0  ;;  %3247 = vmatprep.subr.bf16.mxu1 %v4361_v0  ;;  %v2169_v59 = vpack.c.bf16 %v3603_v48, %v3603_v48  ;;  %v3577_v48 = vld [vmem:[#allocation27 + $0x8] sm:$0xff]  }
 0xddc   : > { %2167 = vadd.xlane.f32.xlu0 %v2166_v50  ;;  %v2286_v58 = vpop.permute.xlu1 %2285  ;;  %v2485_v50 = vsel %vm1029_vm1, %v3577_v48, 0 }
 0xddd   : > { %v2291_v60 = vsel %vm1225_vm3, %v2286_v58, 0 }
 0xde2   : > { %v3605_v49 = vpop.eup %3604 }
 0xde3   : > { %v3607_v51 = vpop.eup %3606  ;;  %v2281_v53 = vsel %vm1162_vm2, %v3605_v49, 0.0  ;;  %v2284_v61 = vpack.c.bf16 %v3605_v49, %v3605_v49 }
 0xde4   : > { %2282 = vadd.xlane.f32.xlu0 %v2281_v53  ;;  %v2051_v54 = vsel %vm1162_vm2, %v3607_v51, 0.0  ;;  %v2054_v55 = vpack.c.bf16 %v3607_v51, %v3607_v51  ;;  %v3579_v51 = vld [vmem:[#allocation27 + $0x18] sm:$0xff]   ;;  %v3580_v53 = vld [vmem:[#allocation30] sm:$0xff]  }
 0xde5   : > { %2052 = vadd.xlane.f32.xlu1 %v2051_v54  ;;  %v2491_v52 = vsel %vm1029_vm1, %v3579_v51, 0  ;;  %v2561_v54 = vsel %vm2556_vm7, %v3580_v53, 0 }
 0xde6   : > { %3238 = vmatmul.mubr.msk.bf16.vlgmr.msra.gmra.mrb[32].mxu1 %vm1162_vm2, %v2054_v55 }
 0xde7   : > { %3248 = vmatpush3.bf16.msra.mxu1 %v2176_v56  ;;  %3249 = vmatprep.mubr.msk.bf16.mxu1 %vm4362_vm0, %v4361_v0 }
 0xde8   : > { %3259 = vmatprep.subr.bf16.mxu1 %v4361_v0 }
 0xde9   : > { %1939 = vadd.xlane.f32.xlu1 %v1938_v57 }
 0xdee   : > { %3250 = vmatmul.mubr.msk.bf16.vlgmr.msra.gmra.mrb[36].mxu1 %vm1162_vm2, %v2169_v59  ;;  %v3041_v59 = vld [vmem:[#allocation24] ss:$0 sm:$0xff] }
 0xdef   : > { %3260 = vmatpush3.bf16.msra.mxu1 %v2291_v60  ;;  %3261 = vmatprep.mubr.msk.bf16.mxu1 %vm4362_vm0, %v4361_v0 }
 0xdf0   : > { %3273 = vmatprep.subr.bf16.mxu1 %v4361_v0 }
 0xdf6   : > { %3262 = vmatmul.mubr.msk.bf16.vlgmr.msra.gmra.mrb[40].mxu1 %vm1162_vm2, %v2284_v61  ;;  %v3042_v61 = vld [vmem:[#allocation26] ss:$0 sm:$0xff] }
 0xdf7   : > { %3281 = vmatprep.mubr.msk.bf16.mxu1 %vm4362_vm0, %v4361_v0 }
 0xdf8   : > { %3274 = vmatpush3.bf16.xpose.msra.mxu1 %v2482_v41 }
 0xdf9   : > { %3275 = vmatprep.subr.bf16.mxu1 %v4361_v0 }
 0xe00   : > { %3276 = vmatpush3.bf16.xpose.msra.mxu1 %v2485_v50 }
 0xe01   : > { %3277 = vmatprep.subr.bf16.mxu1 %v4361_v0 }
 0xe69   : > { %v2168_v3 = vpop.xlane.xlu0 %2167 }
 0xe71   : > { %v2283_v11 = vpop.xlane.xlu0 %2282 }
 0xe72   : > { %v2053_v62 = vpop.xlane.xlu1 %2052 }
 0xe76   : > { %v1940_v63 = vpop.xlane.xlu1 %1939 }
 0xe77   : > { %3608 = vrcp.f32 %v1940_v63 }
 0xe78   : > { %3610 = vrcp.f32 %v2053_v62 }
 0xe79   : > { %3612 = vrcp.f32 %v2168_v3 }
 0xe7a   : > { %3614 = vrcp.f32 %v2283_v11  ;;  %v3049_v11 = vld [vmem:[#allocation32] ss:$0 sm:$0xff] }
 0xe81   : > { %v3609_v1 = vpop.eup %3608 }
 0xe82   : > { %v1992_v2 = vmul.f32 %v3609_v1, %v5299_v19  ;;  %v3611_v5 = vpop.eup %3610 }
 0xe83   : > { %v3613_v15 = vpop.eup %3612 }
 0xe84   : > { %1993 = vst.msk [vmem:[#allocation2] sm:$0xff] %vm1162_vm2, %v1992_v2  ;;  %v3615_v21 = vpop.eup %3614  ;;  %v3581_v2 = vld [vmem:[#allocation30 + $0x8] sm:$0xff]  }
 0xe85   : > { %v2564_v3 = vsel %vm2556_vm7, %v3581_v2, 0 }
 0xeb9   : > { %v2097_v6 = vpop.f32.mrb[32].mxu1 }
 0xeba   : > { %v2104_v8 = vmul.f32 %v3611_v5, %v2097_v6  ;;  %v3239_v9 = vpop.f32.mrb[33].mxu1 }
 0xebb   : > { %v2100_v10 = vpop.f32.mrb[34].mxu1 }
 0xebc   : > { %v3240_v13 = vpop.f32.mrb[35].mxu1  ;;  %2106 = vrot.lane.b32.xlu0 %v2104_v8, %s4370_s0 }
 0xec1   : > { %v2212_v16 = vpop.f32.mrb[36].mxu1 }
 0xec2   : > { %v2219_v18 = vmul.f32 %v3613_v15, %v2212_v16  ;;  %v3251_v19 = vpop.f32.mrb[37].mxu1 }
 0xec3   : > { %v2215_v20 = vpop.f32.mrb[38].mxu1 }
 0xec4   : > { %v3252_v12 = vpop.f32.mrb[39].mxu1  ;;  %2221 = vrot.lane.b32.xlu1 %v2219_v18, %s4371_s3 }
 0xec9   : > { %v2327_v22 = vpop.f32.mrb[40].mxu1 }
 0xeca   : > { %v2334_v23 = vmul.f32 %v3615_v21, %v2327_v22  ;;  %v3263_v24 = vpop.f32.mrb[41].mxu1 }
 0xecb   : > { %v2330_v25 = vpop.f32.mrb[42].mxu1 }
 0xecc   : > { %v3264_v26 = vpop.f32.mrb[43].mxu1  ;;  %2336 = vrot.lane.b32.xlu1 %v2334_v23, %s4372_s5 }
 0xf2e   : > { %v2107_v27 = vpop.permute.xlu0 %2106 }
 0xf2f   : > { %2109 = vst.msk [vmem:[#allocation2] sm:$0xff] %vm1387_vm4, %v2107_v27 }
 0xf36   : > { %v2222_v28 = vpop.permute.xlu1 %2221 }
 0xf37   : > { %2224 = vst.msk [vmem:[#allocation2] sm:$0xff] %vm1503_vm5, %v2222_v28  ;;  %v3053_v28 = vld [vmem:[#allocation33] ss:$0 sm:$0xff] }
 0xf3e   : > { %v2337_v29 = vpop.permute.xlu1 %2336 }
 0xf3f   : > { %2339 = vst.msk [vmem:[#allocation2] sm:$0xff] %vm1619_vm6, %v2337_v29 }
 0xf46   : > { %v2340_v30 = vld [vmem:[#allocation2] sm:$0xff] }
 0xf47   : > { %v2345_v31 = vpack.c.bf16 %v2340_v30, %v2340_v30  ;;  %v3054_v30 = vld [vmem:[#allocation35] ss:$0 sm:$0xff] }
 0xf49   : > { %3270 = vmatmul.mubr.msk.bf16.vlgmr.msra.gmra.mrb[40].mxu0 %vm1029_vm1, %v2345_v31 }
 0xf4a   : > { %3289 = vmatprep.mubr.msk.bf16.mxu0 %vm4362_vm0, %v4361_v0  ;;  %3286 = vmatpush3.bf16.xpose.msra.mxu0 %v2561_v54 }
 0xf4b   : > { %3287 = vmatprep.subr.bf16.mxu0 %v4361_v0 }
 0xf52   : > { %3288 = vmatpush3.bf16.xpose.msra.mxu0 %v2564_v3 }
0x101c   : > { %v2406_v33 = vpop.f32.mrb[40].mxu0 }
0x101d   : > { %v2407_v34 = vadd.f32 %v3037_v32, %v2406_v33  ;;  %v3271_v35 = vpop.f32.mrb[41].mxu0 }
0x101e   : > { %v2409_v36 = vpop.f32.mrb[42].mxu0 }
0x101f   : > { %v3272_v37 = vpop.f32.mrb[43].mxu0  ;;  %v2412_v38 = vadd.f32 %v2407_v34, %v5248_v42  ;;  %v3578_v42 = vld [vmem:[#allocation27 + $0x10] sm:$0xff]  }
0x1020   : > { %v2488_v49 = vsel %vm1029_vm1, %v3578_v42, 0 }
0x1021   : > { %v2415_v39 = vsel %vm1029_vm1, %v2412_v38, 0.0  ;;  %3278 = vmatpush3.bf16.xpose.msra.mxu1 %v2488_v49 }
0x1022   : > { %2416 = vadd.xlane.f32.xlu0 %v2415_v39  ;;  %3279 = vmatprep.subr.bf16.mxu1 %v4361_v0 }
0x1029   : > { %3280 = vmatpush3.bf16.xpose.msra.mxu1 %v2491_v52 }
0x10af   : > { %v2417_v43 = vpop.xlane.xlu0 %2416 }
0x10b0   : > { %v2418_v44 = vmul.f32 0.03125, %v2417_v43 }
0x10b2   : > { %v2419_v45 = vsub.f32 %v2412_v38, %v2418_v44 }
0x10b4   : > { %v2420_v46 = vmul.f32 %v2419_v45, %v2419_v45 }
0x10b6   : > { %v2421_v47 = vsel %vm1029_vm1, %v2420_v46, 0.0 }
0x10b7   : > { %2422 = vadd.xlane.f32.xlu1 %v2421_v47 }
0x1144   : > { %v2423_v55 = vpop.xlane.xlu1 %2422 }
0x1145   : > { %v2424_v56 = vmul.f32 0.03125, %v2423_v55 }
0x1147   : > { %v2425_v57 = vadd.f32 1e-05, %v2424_v56 }
0x1149   : > { %3616 = vrsqrt.f32 %v2425_v57 }
0x1153   : > { %v3617_v58 = vpop.eup %3616 }
0x1154   : > { %v2427_v60 = vmul.f32 %v3617_v58, %v2419_v45 }
0x1156   : > { %v2434_v62 = vmul.f32 %v3041_v59, %v2427_v60 }
0x1158   : > { %v2441_v63 = vadd.f32 %v3042_v61, %v2434_v62 }
0x115a   : > { %v2450_v1 = vpack.c.bf16 %v2441_v63, %v2441_v63 }
0x115c   : > { %3282 = vmatmul.mubr.msk.bf16.vlgmr.msra.gmra.mrb[44].mxu1 %vm1029_vm1, %v2450_v1 }
0x122f   : > { %v2527_v5 = vpop.f32.mrb[44].mxu1 }
0x1230   : > { %v2528_v0 = vadd.f32 %v3043_v4, %v2527_v5  ;;  %v3283_v6 = vpop.f32.mrb[45].mxu1 }
0x1231   : > { %v2530_v7 = vpop.f32.mrb[46].mxu1 }
0x1232   : > { %v2533_v8 = vmax.f32 %v2528_v0, 0.0  ;;  %v3284_v9 = vpop.f32.mrb[47].mxu1 }
0x1234   : > { %v2538_v10 = vpack.c.bf16 %v2533_v8, %v2533_v8 }
0x1236   : > { %3290 = vmatmul.mubr.msk.bf16.vlgmr.msra.gmra.mrb[44].mxu0 %vm2556_vm7, %v2538_v10 }
0x1309   : > { %v2600_v13 = vpop.f32.mrb[44].mxu0 }
0x130a   : > { %v2601_v14 = vadd.f32 %v3049_v11, %v2600_v13  ;;  %v3291_v15 = vpop.f32.mrb[45].mxu0 }
0x130b   : > { %v2603_v16 = vpop.f32.mrb[46].mxu0 }
0x130c   : > { %v3292_v17 = vpop.f32.mrb[47].mxu0  ;;  %v2606_v18 = vadd.f32 %v2601_v14, %v2441_v63 }
0x130e   : > { %v2609_v19 = vsel %vm1029_vm1, %v2606_v18, 0.0 }
0x130f   : > { %2610 = vadd.xlane.f32.xlu0 %v2609_v19 }
0x139c   : > { %v2611_v20 = vpop.xlane.xlu0 %2610 }
0x139d   : > { %v2612_v12 = vmul.f32 0.03125, %v2611_v20 }
0x139f   : > { %v2613_v21 = vsub.f32 %v2606_v18, %v2612_v12 }
0x13a1   : > { %v2614_v22 = vmul.f32 %v2613_v21, %v2613_v21 }
0x13a3   : > { %v2615_v23 = vsel %vm1029_vm1, %v2614_v22, 0.0 }
0x13a4   : > { %2616 = vadd.xlane.f32.xlu0 %v2615_v23 }
0x1431   : > { %v2617_v24 = vpop.xlane.xlu0 %2616 }
0x1432   : > { %v2618_v25 = vmul.f32 0.03125, %v2617_v24 }
0x1434   : > { %v2619_v26 = vadd.f32 1e-05, %v2618_v25 }
0x1436   : > { %3618 = vrsqrt.f32 %v2619_v26 }
0x1440   : > { %v3619_v27 = vpop.eup %3618 }
0x1441   : > { %v2621_v29 = vmul.f32 %v3619_v27, %v2613_v21 }
0x1443   : > { %v2628_v31 = vmul.f32 %v3053_v28, %v2621_v29 }
0x1445   : > { %v2635_v32 = vadd.f32 %v3054_v30, %v2628_v31 }
0x1447   : > { %2636 = vst.msk [vmem:[%s996_s9] sm:$0xff] %vm1029_vm1, %v2635_v32 }
0x1448   : > { %4227 = shalt.err (!%p4224_p10)
}
0x1449   : > { %s4228_s4 = scalar_lea.hbm %s5367_s8, 128  ;;  %s4232_s1 = scalar_lea.hbm %s5569_s19, 256 }
0x144a   : > { %p4229_p0 = scmp.ne.s32.totalorder %s5367_s8, %s4228_s4  ;;  %p4233_p11 = scmp.lt.u32.totalorder %s5367_s8, %s5569_s19 }
0x144b   : > { %p4234_p13 = scmp.lt.u32.totalorder %s4232_s1, %s4228_s4  ;;  %p4236_p7 = scmp.lt.u32.totalorder %s4228_s4, %s5367_s8 }
0x144c   : > { %p4230_p5 = pnand %p4229_p0, %p5570_p6 }
0x144d   : > { %p4235_p4 = por %p4234_p13, %p4233_p11 }
0x144e   : > { %p4231_p8 = pneg %p4230_p5 }
0x144f   : > { %p4237_p3 = por %p4236_p7, %p4235_p4 }
0x1451   : > { %p4238_p2 = pnand %p4237_p3, %p4231_p8 }
0x1453   : > { %4241 = shalt.err (!%p4238_p2)
}
0x1454   : > { %3371 = dma.vmem_to_hbm [thread:$0]  (%p5570_p6), %s5369_s30, 128, %s5367_s8, %s2638_s29  }
0x1455 PF: > { %s2664_s5 = sand.u32 1, %s4316_s2   ;;  %p5571_p12 = scmp.ne.s32.totalorder %s5526_s24, 0 }
0x1456   : > { %p5572_p1 = scmp.ge.s32.totalorder %s4336_s28, 2  ;;  %s2665_s15 = scalar_lea.sflag [#allocation5], %s2664_s5 }
0x1458   : > { %p3439_p9 = pnand %p5572_p1, %p5571_p12 }
0x145a   : > { %4311 = dma.done.wait (!%p3439_p9), %s2665_s15, 128  }
0x145b   : > { %4313 = vsyncadd (!%p3439_p9), %s2665_s15, 4294967168  ;;  %s49_s28 = sadd.s32 1, %s4336_s28   ;;  %s5573_s27 = sld [smem:[#allocation50_spill]] }
0x145c   : > { %p46_p10 = scmp.ge.s32.totalorder %s49_s28, 4   ;;  %s5574_s3 = sld [smem:[#allocation52_spill]] }
0x145d   : > { %s5575_s2 = smov %s4320_s25  ;;  %s5576_s25 = smov %s4324_s26 }
0x145e   : > { %s5577_s26 = smov %s4765_s6  ;;  %48 = sbr.rel (!%p46_p10) target bundleno = 40 (0x28), region = 245 }
0x1465   :  { %2670 = vsyncpa [#allocation4], 1 }
0x1466   :  { %2672 = vsyncpa [#allocation4 + $0x1], 1 }
0x1467   :  { %2673 = vsyncpa [#allocation7], 1 }
0x1468   :  { %2675 = vsyncpa [#allocation7 + $0x1], 1 }
0x1469   :  { %2676 = vsyncpa [#allocation10], 1 }
0x146a   :  { %2677 = vsyncpa [#allocation13], 1 }
0x146b   :  { %2678 = vsyncpa [#allocation16], 1 }
0x146c   :  { %2679 = vsyncpa [#allocation19], 1 }
0x146d   :  { %2680 = vsyncpa [#allocation22], 1 }
0x146e   :  { %2681 = vsyncpa [#allocation25], 1 }
0x146f   :  { %2682 = vsyncpa [#allocation28], 1 }
0x1470   :  { %2683 = vsyncpa [#allocation31], 1 }
0x1471   :  { %2684 = vsyncpa [#allocation34], 1 }
0x1472   :  { %2685 = vsyncpa [#allocation5], 1 }
0x1473   :  { %2687 = vsyncpa [#allocation5 + $0x1], 1 }

</bundles_post_ra>
